<compile_context>
chip_gen: v7x
topology: tpu7x:2x2x1
jax: 0.10.0
libtpu: 0.0.40
codegen_flags: <defaults>
</compile_context>

<pallas_src>
import math
from functools import partial

import jax
import jax.numpy as jnp
from jax.experimental import pallas as pl
from jax.experimental.pallas import tpu as pltpu

# ----------------------------- config (small) ------------------------------
PATCH = 14          # hardcoded in the PyTorch forward
IN_CH = 3           # c * 14 * 14 = 588 in the real model -> c = 3
IMG = 56            # 56 / 14 = 4 -> 4x4 = 16 patches (embed_len)
EMBED_DIM = 128     # real: 1152
NUM_HEADS = 4       # real: 16
MLP_HIDDEN = 256    # real: 4304
NUM_BLOCKS = 3      # real: 27
LN_EPS = 1e-5       # PyTorch nn.LayerNorm default

K_IN = IN_CH * PATCH * PATCH      # 588
K_PAD = 640                       # 588 padded up to a multiple of 128 lanes
NEG_INF = -1e30


# --------------------------- math helpers (f32) ------------------------------
def _layernorm_f32(x, g, b, eps):
    x = x.astype(jnp.float32)
    mean = jnp.mean(x, axis=-1, keepdims=True)
    var = jnp.mean((x - mean) * (x - mean), axis=-1, keepdims=True)
    return (x - mean) * jax.lax.rsqrt(var + eps) * g + b


def _gelu_tanh(x):
    c = math.sqrt(2.0 / math.pi)
    return 0.5 * x * (1.0 + jnp.tanh(c * (x + 0.044715 * x * x * x)))


def _patchify(x):
    """LinearPatchEmbedding reshape/permute (pure layout glue)."""
    b, c, hp1, wp2 = x.shape
    p1, p2 = PATCH, PATCH
    h, w = hp1 // p1, wp2 // p2
    xs = x.reshape(b, c, h, p1, w, p2).transpose(0, 2, 4, 1, 3, 5)
    return xs.reshape(b, h * w, c * p1 * p2), h * w


# ------------------------------ fused kernel --------------------------------
def _vit_kernel(xp_ref, pw_ref, pb_ref, pos_ref, bias_ref, ng_ref, nb_ref,
                ln1g_ref, ln1b_ref, qkvw_ref, qkvb_ref, projw_ref, projb_ref,
                ln2g_ref, ln2b_ref, fc1w_ref, fc1b_ref, fc2w_ref, fc2b_ref,
                out_ref, *, num_heads, eps):
    l = pl.program_id(0)

    # --- grid step 0: seed the resident activation with patch-embed + pos ---
    @pl.when(l == 0)
    def _():
        y = jnp.dot(xp_ref[...].astype(jnp.bfloat16), pw_ref[...],
                    preferred_element_type=jnp.float32)
        out_ref[...] = y + pb_ref[...] + pos_ref[...]

    x = out_ref[...]                    # (BN, D) f32 residual stream (VMEM-resident)
    BN, D = x.shape
    H = num_heads
    Dh = D // H

    # ------------------------- attention branch -----------------------------
    xn = _layernorm_f32(x, ln1g_ref[0], ln1b_ref[0], eps)
    qkv = jnp.dot(xn.astype(jnp.bfloat16), qkvw_ref[0],
                  preferred_element_type=jnp.float32) + qkvb_ref[0]   # (BN, 3D)

    bias = bias_ref[...]                # (BN, BN) block-diagonal 0 / -1e30
    scale = 1.0 / math.sqrt(Dh)         # F.scaled_dot_product_attention default
    heads = []
    for h in range(H):                  # static unroll, all inside the one kernel
        q = (qkv[:, h * Dh:(h + 1) * Dh] * scale).astype(jnp.bfloat16)
        k = qkv[:, D + h * Dh:D + (h + 1) * Dh].astype(jnp.bfloat16)
        v = qkv[:, 2 * D + h * Dh:2 * D + (h + 1) * Dh].astype(jnp.bfloat16)
        s = jax.lax.dot_general(q, k, (((1,), (1,)), ((), ())),
                                preferred_element_type=jnp.float32)   # (BN, BN)
        s = s + bias
        m = jnp.max(s, axis=-1, keepdims=True)
        p = jnp.exp(s - m)
        denom = jnp.sum(p, axis=-1, keepdims=True)
        p = p * pl.reciprocal(denom, approx=True)                     # EUP slot
        heads.append(jnp.dot(p.astype(jnp.bfloat16), v,
                             preferred_element_type=jnp.float32))     # (BN, Dh)
    attn = jnp.concatenate(heads, axis=-1)                            # (BN, D)
    proj = jnp.dot(attn.astype(jnp.bfloat16), projw_ref[0],
                   preferred_element_type=jnp.float32) + projb_ref[0]
    x = x + proj

    # ---------------------------- MLP branch --------------------------------
    xn = _layernorm_f32(x, ln2g_ref[0], ln2b_ref[0], eps)
    h1 = jnp.dot(xn.astype(jnp.bfloat16), fc1w_ref[0],
                 preferred_element_type=jnp.float32) + fc1b_ref[0]
    h1 = _gelu_tanh(h1)                                               # f32 VPU/EUP
    h2 = jnp.dot(h1.astype(jnp.bfloat16), fc2w_ref[0],
                 preferred_element_type=jnp.float32) + fc2b_ref[0]
    x = x + h2

    out_ref[...] = x

    # --- last grid step: final LayerNorm in place, single HBM writeback -----
    @pl.when(l == pl.num_programs(0) - 1)
    def _():
        out_ref[...] = _layernorm_f32(out_ref[...], ng_ref[...], nb_ref[...], eps)


# ------------------------------- forward ------------------------------------
def vision_transformer(x, params):
    xs, N = _patchify(x)
    b = x.shape[0]
    D = EMBED_DIM
    BN = b * N

    xp = xs.reshape(BN, K_IN)
    xp = jnp.pad(xp, ((0, 0), (0, K_PAD - K_IN)))                     # 588 -> 640
    pos = jnp.broadcast_to(params["pos_embed"], (b, N, D)).reshape(BN, D)

    # Block-diagonal additive attention bias: rows/cols of the same image get 0,
    # cross-batch pairs get -1e30. Constant across blocks -> resident in VMEM.
    row_b = jax.lax.broadcasted_iota(jnp.int32, (BN, BN), 0) // N
    col_b = jax.lax.broadcasted_iota(jnp.int32, (BN, BN), 1) // N
    attn_bias = jnp.where(row_b == col_b, 0.0, NEG_INF).astype(jnp.float32)

    L = NUM_BLOCKS
    out = pl.pallas_call(
        partial(_vit_kernel, num_heads=NUM_HEADS, eps=LN_EPS),
        out_shape=jax.ShapeDtypeStruct((BN, D), jnp.float32),
        grid=(L,),
        in_specs=[
            # constant-index (loaded once, resident in VMEM)
            pl.BlockSpec((BN, K_PAD), lambda l: (0, 0)),              # xp
            pl.BlockSpec((K_PAD, D), lambda l: (0, 0)),               # patch_w
            pl.BlockSpec((1, D), lambda l: (0, 0)),                   # patch_b
            pl.BlockSpec((BN, D), lambda l: (0, 0)),                  # pos
            pl.BlockSpec((BN, BN), lambda l: (0, 0)),                 # attn_bias
            pl.BlockSpec((1, D), lambda l: (0, 0)),                   # norm_g
            pl.BlockSpec((1, D), lambda l: (0, 0)),                   # norm_b
            # per-block stacked weights (streamed / double-buffered over l)
            pl.BlockSpec((1, 1, D), lambda l: (l, 0, 0)),             # ln1_g
            pl.BlockSpec((1, 1, D), lambda l: (l, 0, 0)),             # ln1_b
            pl.BlockSpec((1, D, 3 * D), lambda l: (l, 0, 0)),         # qkv_w
            pl.BlockSpec((1, 1, 3 * D), lambda l: (l, 0, 0)),         # qkv_b
            pl.BlockSpec((1, D, D), lambda l: (l, 0, 0)),             # proj_w
            pl.BlockSpec((1, 1, D), lambda l: (l, 0, 0)),             # proj_b
            pl.BlockSpec((1, 1, D), lambda l: (l, 0, 0)),             # ln2_g
            pl.BlockSpec((1, 1, D), lambda l: (l, 0, 0)),             # ln2_b
            pl.BlockSpec((1, D, MLP_HIDDEN), lambda l: (l, 0, 0)),    # fc1_w
            pl.BlockSpec((1, 1, MLP_HIDDEN), lambda l: (l, 0, 0)),    # fc1_b
            pl.BlockSpec((1, MLP_HIDDEN, D), lambda l: (l, 0, 0)),    # fc2_w
            pl.BlockSpec((1, 1, D), lambda l: (l, 0, 0)),             # fc2_b
        ],
        out_specs=pl.BlockSpec((BN, D), lambda l: (0, 0)),            # resident acc
        compiler_params=pltpu.CompilerParams(
            dimension_semantics=("arbitrary",)),
    )(xp, params["patch_w"], params["patch_b"], pos, attn_bias,
      params["norm_g"], params["norm_b"],
      params["ln1_g"], params["ln1_b"], params["qkv_w"], params["qkv_b"],
      params["proj_w"], params["proj_b"], params["ln2_g"], params["ln2_b"],
      params["fc1_w"], params["fc1_b"], params["fc2_w"], params["fc2_b"])

    return out.reshape(b, N, D)


# --------------------------- pure-JAX reference ------------------------------
def vision_transformer_ref(x, params):
    xs, N = _patchify(x)
    b = x.shape[0]
    D = EMBED_DIM
    H, Dh = NUM_HEADS, EMBED_DIM // NUM_HEADS
    BN = b * N

    xp = jnp.pad(xs.reshape(BN, K_IN), ((0, 0), (0, K_PAD - K_IN)))
    pos = jnp.broadcast_to(params["pos_embed"], (b, N, D)).reshape(BN, D)

    row_b = jax.lax.broadcasted_iota(jnp.int32, (BN, BN), 0) // N
    col_b = jax.lax.broadcasted_iota(jnp.int32, (BN, BN), 1) // N
    bias = jnp.where(row_b == col_b, 0.0, NEG_INF).astype(jnp.float32)

    y = jnp.dot(xp.astype(jnp.bfloat16), params["patch_w"],
                preferred_element_type=jnp.float32)
    xr = y + params["patch_b"] + pos

    scale = 1.0 / math.sqrt(Dh)
    for l in range(NUM_BLOCKS):
        xn = _layernorm_f32(xr, params["ln1_g"][l, 0], params["ln1_b"][l, 0], LN_EPS)
        qkv = jnp.dot(xn.astype(jnp.bfloat16), params["qkv_w"][l],
                      preferred_element_type=jnp.float32) + params["qkv_b"][l, 0]
        heads = []
        for h in range(H):
            q = (qkv[:, h * Dh:(h + 1) * Dh] * scale).astype(jnp.bfloat16)
            k = qkv[:, D + h * Dh:D + (h + 1) * Dh].astype(jnp.bfloat16)
            v = qkv[:, 2 * D + h * Dh:2 * D + (h + 1) * Dh].astype(jnp.bfloat16)
            s = jax.lax.dot_general(q, k, (((1,), (1,)), ((), ())),
                                    preferred_element_type=jnp.float32) + bias
            p = jax.nn.softmax(s, axis=-1)
            heads.append(jnp.dot(p.astype(jnp.bfloat16), v,
                                 preferred_element_type=jnp.float32))
        attn = jnp.concatenate(heads, axis=-1)
        proj = jnp.dot(attn.astype(jnp.bfloat16), params["proj_w"][l],
                       preferred_element_type=jnp.float32) + params["proj_b"][l, 0]
        xr = xr + proj

        xn = _layernorm_f32(xr, params["ln2_g"][l, 0], params["ln2_b"][l, 0], LN_EPS)
        h1 = jnp.dot(xn.astype(jnp.bfloat16), params["fc1_w"][l],
                     preferred_element_type=jnp.float32) + params["fc1_b"][l, 0]
        h1 = _gelu_tanh(h1)
        h2 = jnp.dot(h1.astype(jnp.bfloat16), params["fc2_w"][l],
                     preferred_element_type=jnp.float32) + params["fc2_b"][l, 0]
        xr = xr + h2

    out = _layernorm_f32(xr, params["norm_g"], params["norm_b"], LN_EPS)
    return out.reshape(b, N, D)


# ------------------------------ param init ----------------------------------
def init_params(key):
    D, H3, HID, L = EMBED_DIM, 3 * EMBED_DIM, MLP_HIDDEN, NUM_BLOCKS
    ks = jax.random.split(key, 11)

    def w(k, shape, scale=0.02):
        return jax.random.normal(k, shape, jnp.float32) * scale

    # patch weight padded with zero rows 588..639 (free offline, no masked loads)
    patch_w = jnp.zeros((K_PAD, D), jnp.float32).at[:K_IN].set(w(ks[0], (K_IN, D)))

    embed_len = (IMG // PATCH) * (IMG // PATCH)
    return dict(
        patch_w=patch_w.astype(jnp.bfloat16),
        patch_b=w(ks[1], (1, D), 0.01),
        pos_embed=w(ks[2], (1, embed_len, D)),
        ln1_g=jnp.ones((L, 1, D), jnp.float32),
        ln1_b=jnp.zeros((L, 1, D), jnp.float32),
        qkv_w=w(ks[3], (L, D, H3)).astype(jnp.bfloat16),
        qkv_b=w(ks[4], (L, 1, H3), 0.01),
        proj_w=w(ks[5], (L, D, D)).astype(jnp.bfloat16),
        proj_b=w(ks[6], (L, 1, D), 0.01),
        ln2_g=jnp.ones((L, 1, D), jnp.float32),
        ln2_b=jnp.zeros((L, 1, D), jnp.float32),
        fc1_w=w(ks[7], (L, D, HID)).astype(jnp.bfloat16),
        fc1_b=w(ks[8], (L, 1, HID), 0.01),
        fc2_w=w(ks[9], (L, HID, D)).astype(jnp.bfloat16),
        fc2_b=w(ks[10], (L, 1, D), 0.01),
        norm_g=jnp.ones((1, D), jnp.float32),
        norm_b=jnp.zeros((1, D), jnp.float32),
    )


# --------------------------------- main --------------------------------------
if __name__ == "__main__":
    key = jax.random.PRNGKey(0)
    kx, kp = jax.random.split(key)

    # Input image batch, NCHW like the PyTorch module: (B, C, H, W)
    x = jax.random.normal(kx, (2, IN_CH, IMG, IMG), jnp.float32)
    params = init_params(kp)

    fwd = jax.jit(vision_transformer)
    out = jax.block_until_ready(fwd(x, params))

    expected_tokens = (IMG // PATCH) * (IMG // PATCH)
    assert out.shape == (2, expected_tokens, EMBED_DIM), out.shape
    assert bool(jnp.all(jnp.isfinite(out)))

    # Correctness check vs a pure-JAX reference (same bf16 casting policy;
    # loose tolerance covers the approx softmax reciprocal in the kernel).
    ref = jax.block_until_ready(jax.jit(vision_transformer_ref)(x, params))
    max_err = float(jnp.max(jnp.abs(out - ref)))
    assert max_err < 5e-2, f"max abs err {max_err}"

    print("KERNEL_OK")
</pallas_src>

<mosaic_0001>
module attributes {stable_mosaic.version = 11 : i64} {
  func.func @_vit_kernel(%arg0: i32, %arg1: memref<32x640xf32, #tpu.memory_space<vmem>>, %arg2: memref<640x128xbf16, #tpu.memory_space<vmem>>, %arg3: memref<1x128xf32, #tpu.memory_space<vmem>>, %arg4: memref<32x128xf32, #tpu.memory_space<vmem>>, %arg5: memref<32x32xf32, #tpu.memory_space<vmem>>, %arg6: memref<1x128xf32, #tpu.memory_space<vmem>>, %arg7: memref<1x128xf32, #tpu.memory_space<vmem>>, %arg8: memref<1x1x128xf32, #tpu.memory_space<vmem>>, %arg9: memref<1x1x128xf32, #tpu.memory_space<vmem>>, %arg10: memref<1x128x384xbf16, #tpu.memory_space<vmem>>, %arg11: memref<1x1x384xf32, #tpu.memory_space<vmem>>, %arg12: memref<1x128x128xbf16, #tpu.memory_space<vmem>>, %arg13: memref<1x1x128xf32, #tpu.memory_space<vmem>>, %arg14: memref<1x1x128xf32, #tpu.memory_space<vmem>>, %arg15: memref<1x1x128xf32, #tpu.memory_space<vmem>>, %arg16: memref<1x128x256xbf16, #tpu.memory_space<vmem>>, %arg17: memref<1x1x256xf32, #tpu.memory_space<vmem>>, %arg18: memref<1x256x128xbf16, #tpu.memory_space<vmem>>, %arg19: memref<1x1x128xf32, #tpu.memory_space<vmem>>, %arg20: memref<32x128xf32, #tpu.memory_space<vmem>>) attributes {dimension_semantics = [#tpu.dimension_semantics<arbitrary>], iteration_bounds = array<i64: 3>, scalar_prefetch = 0 : i64, scratch_operands = 0 : i64, tpu.core_type = #tpu.core_type<tc>, window_params = [{pipeline_mode = #tpu.pipeline_mode<synchronous>, transform_indices = @transform_0, window_bounds = array<i64: 32, 640>}, {pipeline_mode = #tpu.pipeline_mode<synchronous>, transform_indices = @transform_1, window_bounds = array<i64: 640, 128>}, {pipeline_mode = #tpu.pipeline_mode<synchronous>, transform_indices = @transform_2, window_bounds = array<i64: 1, 128>}, {pipeline_mode = #tpu.pipeline_mode<synchronous>, transform_indices = @transform_3, window_bounds = array<i64: 32, 128>}, {pipeline_mode = #tpu.pipeline_mode<synchronous>, transform_indices = @transform_4, window_bounds = array<i64: 32, 32>}, {pipeline_mode = #tpu.pipeline_mode<synchronous>, transform_indices = @transform_5, window_bounds = array<i64: 1, 128>}, {pipeline_mode = #tpu.pipeline_mode<synchronous>, transform_indices = @transform_6, window_bounds = array<i64: 1, 128>}, {transform_indices = @transform_7, window_bounds = array<i64: 1, 1, 128>}, {transform_indices = @transform_8, window_bounds = array<i64: 1, 1, 128>}, {transform_indices = @transform_9, window_bounds = array<i64: 1, 128, 384>}, {transform_indices = @transform_10, window_bounds = array<i64: 1, 1, 384>}, {transform_indices = @transform_11, window_bounds = array<i64: 1, 128, 128>}, {transform_indices = @transform_12, window_bounds = array<i64: 1, 1, 128>}, {transform_indices = @transform_13, window_bounds = array<i64: 1, 1, 128>}, {transform_indices = @transform_14, window_bounds = array<i64: 1, 1, 128>}, {transform_indices = @transform_15, window_bounds = array<i64: 1, 128, 256>}, {transform_indices = @transform_16, window_bounds = array<i64: 1, 1, 256>}, {transform_indices = @transform_17, window_bounds = array<i64: 1, 256, 128>}, {transform_indices = @transform_18, window_bounds = array<i64: 1, 1, 128>}, {pipeline_mode = #tpu.pipeline_mode<synchronous>, transform_indices = @transform_19, window_bounds = array<i64: 32, 128>}]} {
    %c0_i32 = arith.constant 0 : i32
    %0 = arith.cmpi eq, %arg0, %c0_i32 : i32
    %1 = arith.extui %0 : i1 to i32
    %c0_i32_0 = arith.constant 0 : i32
    %2 = arith.cmpi ne, %1, %c0_i32_0 : i32
    scf.if %2 {
      %c0_80 = arith.constant 0 : index
      %c0_81 = arith.constant 0 : index
      %201 = vector.load %arg1[%c0_80, %c0_81] : memref<32x640xf32, #tpu.memory_space<vmem>>, vector<32x640xf32>
      %202 = arith.truncf %201 : vector<32x640xf32> to vector<32x640xbf16>
      %c0_82 = arith.constant 0 : index
      %c0_83 = arith.constant 0 : index
      %203 = vector.load %arg2[%c0_82, %c0_83] : memref<640x128xbf16, #tpu.memory_space<vmem>>, vector<640x128xbf16>
      %cst_84 = arith.constant dense<0.000000e+00> : vector<32x128xf32>
      %204 = tpu.matmul %202, %203, %cst_84 {dimension_numbers = #tpu.dot_dimension_numbers<[1], [0], [0], [1], [0, 0, 1, 1], [], []>} : vector<32x640xbf16>, vector<640x128xbf16>, vector<32x128xf32> -> vector<32x128xf32>
      %c0_85 = arith.constant 0 : index
      %c0_86 = arith.constant 0 : index
      %205 = vector.load %arg3[%c0_85, %c0_86] : memref<1x128xf32, #tpu.memory_space<vmem>>, vector<1x128xf32>
      %206 = vector.broadcast %205 : vector<1x128xf32> to vector<32x128xf32>
      %207 = arith.addf %204, %206 : vector<32x128xf32>
      %c0_87 = arith.constant 0 : index
      %c0_88 = arith.constant 0 : index
      %208 = vector.load %arg4[%c0_87, %c0_88] : memref<32x128xf32, #tpu.memory_space<vmem>>, vector<32x128xf32>
      %209 = arith.addf %207, %208 : vector<32x128xf32>
      %c0_89 = arith.constant 0 : index
      %c0_90 = arith.constant 0 : index
      %210 = vector.load %arg20[%c0_89, %c0_90] : memref<32x128xf32, #tpu.memory_space<vmem>>, vector<32x128xf32>
      tpu.vector_store %arg20[%c0_89, %c0_90], %209 {strides = array<i32>} : memref<32x128xf32, #tpu.memory_space<vmem>>, vector<32x128xf32>,
    } else {
    }
    %c0 = arith.constant 0 : index
    %c0_1 = arith.constant 0 : index
    %3 = vector.load %arg20[%c0, %c0_1] : memref<32x128xf32, #tpu.memory_space<vmem>>, vector<32x128xf32>
    %c0_2 = arith.constant 0 : index
    %c0_3 = arith.constant 0 : index
    %c0_4 = arith.constant 0 : index
    %4 = vector.load %arg8[%c0_2, %c0_3, %c0_4] : memref<1x1x128xf32, #tpu.memory_space<vmem>>, vector<1x1x128xf32>
    %5 = vector.shape_cast %4 : vector<1x1x128xf32> to vector<1x128xf32>
    %c0_5 = arith.constant 0 : index
    %c0_6 = arith.constant 0 : index
    %c0_7 = arith.constant 0 : index
    %6 = vector.load %arg9[%c0_5, %c0_6, %c0_7] : memref<1x1x128xf32, #tpu.memory_space<vmem>>, vector<1x1x128xf32>
    %7 = vector.shape_cast %6 : vector<1x1x128xf32> to vector<1x128xf32>
    %cst = arith.constant dense<0.000000e+00> : vector<32xf32>
    %8 = vector.multi_reduction <add>, %3, %cst [1] : vector<32x128xf32> to vector<32xf32>
    %9 = vector.shape_cast %8 : vector<32xf32> to vector<32x1xf32>
    %cst_8 = arith.constant 1.280000e+02 : f32
    %10 = vector.broadcast %cst_8 : f32 to vector<32x1xf32>
    %11 = arith.divf %9, %10 : vector<32x1xf32>
    %12 = vector.broadcast %11 : vector<32x1xf32> to vector<32x128xf32>
    %13 = arith.subf %3, %12 : vector<32x128xf32>
    %14 = vector.broadcast %11 : vector<32x1xf32> to vector<32x128xf32>
    %15 = arith.subf %3, %14 : vector<32x128xf32>
    %16 = arith.mulf %13, %15 : vector<32x128xf32>
    %cst_9 = arith.constant dense<0.000000e+00> : vector<32xf32>
    %17 = vector.multi_reduction <add>, %16, %cst_9 [1] : vector<32x128xf32> to vector<32xf32>
    %18 = vector.shape_cast %17 : vector<32xf32> to vector<32x1xf32>
    %cst_10 = arith.constant 1.280000e+02 : f32
    %19 = vector.broadcast %cst_10 : f32 to vector<32x1xf32>
    %20 = arith.divf %18, %19 : vector<32x1xf32>
    %21 = vector.broadcast %11 : vector<32x1xf32> to vector<32x128xf32>
    %22 = arith.subf %3, %21 : vector<32x128xf32>
    %cst_11 = arith.constant 9.99999974E-6 : f32
    %23 = vector.broadcast %cst_11 : f32 to vector<32x1xf32>
    %24 = arith.addf %20, %23 : vector<32x1xf32>
    %25 = math.rsqrt %24 : vector<32x1xf32>
    %26 = vector.broadcast %25 : vector<32x1xf32> to vector<32x128xf32>
    %27 = arith.mulf %22, %26 : vector<32x128xf32>
    %28 = vector.broadcast %5 : vector<1x128xf32> to vector<32x128xf32>
    %29 = arith.mulf %27, %28 : vector<32x128xf32>
    %30 = vector.broadcast %7 : vector<1x128xf32> to vector<32x128xf32>
    %31 = arith.addf %29, %30 : vector<32x128xf32>
    %32 = arith.truncf %31 : vector<32x128xf32> to vector<32x128xbf16>
    %c0_12 = arith.constant 0 : index
    %c0_13 = arith.constant 0 : index
    %c0_14 = arith.constant 0 : index
    %33 = vector.load %arg10[%c0_12, %c0_13, %c0_14] : memref<1x128x384xbf16, #tpu.memory_space<vmem>>, vector<1x128x384xbf16>
    %34 = vector.shape_cast %33 : vector<1x128x384xbf16> to vector<128x384xbf16>
    %cst_15 = arith.constant dense<0.000000e+00> : vector<32x384xf32>
    %35 = tpu.matmul %32, %34, %cst_15 {dimension_numbers = #tpu.dot_dimension_numbers<[1], [0], [0], [1], [0, 0, 1, 1], [], []>} : vector<32x128xbf16>, vector<128x384xbf16>, vector<32x384xf32> -> vector<32x384xf32>
    %c0_16 = arith.constant 0 : index
    %c0_17 = arith.constant 0 : index
    %c0_18 = arith.constant 0 : index
    %36 = vector.load %arg11[%c0_16, %c0_17, %c0_18] : memref<1x1x384xf32, #tpu.memory_space<vmem>>, vector<1x1x384xf32>
    %37 = vector.shape_cast %36 : vector<1x1x384xf32> to vector<1x384xf32>
    %38 = vector.broadcast %37 : vector<1x384xf32> to vector<32x384xf32>
    %39 = arith.addf %35, %38 : vector<32x384xf32>
    %c0_19 = arith.constant 0 : index
    %c0_20 = arith.constant 0 : index
    %40 = vector.load %arg5[%c0_19, %c0_20] : memref<32x32xf32, #tpu.memory_space<vmem>>, vector<32x32xf32>
    %41 = vector.extract_strided_slice %39 {offsets = [0, 0], sizes = [32, 32], strides = [1, 1]} : vector<32x384xf32> to vector<32x32xf32>
    %cst_21 = arith.constant 0.176776692 : f32
    %42 = vector.broadcast %cst_21 : f32 to vector<32x32xf32>
    %43 = arith.mulf %41, %42 : vector<32x32xf32>
    %44 = arith.truncf %43 : vector<32x32xf32> to vector<32x32xbf16>
    %45 = vector.extract_strided_slice %39 {offsets = [0, 128], sizes = [32, 32], strides = [1, 1]} : vector<32x384xf32> to vector<32x32xf32>
    %46 = arith.truncf %45 : vector<32x32xf32> to vector<32x32xbf16>
    %47 = vector.extract_strided_slice %39 {offsets = [0, 256], sizes = [32, 32], strides = [1, 1]} : vector<32x384xf32> to vector<32x32xf32>
    %48 = arith.truncf %47 : vector<32x32xf32> to vector<32x32xbf16>
    %cst_22 = arith.constant dense<0.000000e+00> : vector<32x32xf32>
    %49 = tpu.matmul %44, %46, %cst_22 {dimension_numbers = #tpu.dot_dimension_numbers<[1], [1], [0], [0], [0, 0, 1, 0], [], []>} : vector<32x32xbf16>, vector<32x32xbf16>, vector<32x32xf32> -> vector<32x32xf32>
    %50 = arith.addf %49, %40 : vector<32x32xf32>
    %cst_23 = arith.constant dense<0xFF800000> : vector<32xf32>
    %51 = vector.multi_reduction <maximumf>, %50, %cst_23 [1] : vector<32x32xf32> to vector<32xf32>
    %52 = vector.shape_cast %51 : vector<32xf32> to vector<32x1xf32>
    %53 = vector.broadcast %52 : vector<32x1xf32> to vector<32x32xf32>
    %54 = arith.subf %50, %53 : vector<32x32xf32>
    %55 = math.exp %54 : vector<32x32xf32>
    %cst_24 = arith.constant dense<0.000000e+00> : vector<32xf32>
    %56 = vector.multi_reduction <add>, %55, %cst_24 [1] : vector<32x32xf32> to vector<32xf32>
    %57 = vector.shape_cast %56 : vector<32xf32> to vector<32x1xf32>
    %58 = tpu.reciprocal %57 {approx = true} : vector<32x1xf32> -> vector<32x1xf32>
    %59 = vector.broadcast %58 : vector<32x1xf32> to vector<32x32xf32>
    %60 = arith.mulf %55, %59 : vector<32x32xf32>
    %61 = arith.truncf %60 : vector<32x32xf32> to vector<32x32xbf16>
    %cst_25 = arith.constant dense<0.000000e+00> : vector<32x32xf32>
    %62 = tpu.matmul %61, %48, %cst_25 {dimension_numbers = #tpu.dot_dimension_numbers<[1], [0], [0], [1], [0, 0, 1, 1], [], []>} : vector<32x32xbf16>, vector<32x32xbf16>, vector<32x32xf32> -> vector<32x32xf32>
    %63 = vector.extract_strided_slice %39 {offsets = [0, 32], sizes = [32, 32], strides = [1, 1]} : vector<32x384xf32> to vector<32x32xf32>
    %cst_26 = arith.constant 0.176776692 : f32
    %64 = vector.broadcast %cst_26 : f32 to vector<32x32xf32>
    %65 = arith.mulf %63, %64 : vector<32x32xf32>
    %66 = arith.truncf %65 : vector<32x32xf32> to vector<32x32xbf16>
    %67 = vector.extract_strided_slice %39 {offsets = [0, 160], sizes = [32, 32], strides = [1, 1]} : vector<32x384xf32> to vector<32x32xf32>
    %68 = arith.truncf %67 : vector<32x32xf32> to vector<32x32xbf16>
    %69 = vector.extract_strided_slice %39 {offsets = [0, 288], sizes = [32, 32], strides = [1, 1]} : vector<32x384xf32> to vector<32x32xf32>
    %70 = arith.truncf %69 : vector<32x32xf32> to vector<32x32xbf16>
    %cst_27 = arith.constant dense<0.000000e+00> : vector<32x32xf32>
    %71 = tpu.matmul %66, %68, %cst_27 {dimension_numbers = #tpu.dot_dimension_numbers<[1], [1], [0], [0], [0, 0, 1, 0], [], []>} : vector<32x32xbf16>, vector<32x32xbf16>, vector<32x32xf32> -> vector<32x32xf32>
    %72 = arith.addf %71, %40 : vector<32x32xf32>
    %cst_28 = arith.constant dense<0xFF800000> : vector<32xf32>
    %73 = vector.multi_reduction <maximumf>, %72, %cst_28 [1] : vector<32x32xf32> to vector<32xf32>
    %74 = vector.shape_cast %73 : vector<32xf32> to vector<32x1xf32>
    %75 = vector.broadcast %74 : vector<32x1xf32> to vector<32x32xf32>
    %76 = arith.subf %72, %75 : vector<32x32xf32>
    %77 = math.exp %76 : vector<32x32xf32>
    %cst_29 = arith.constant dense<0.000000e+00> : vector<32xf32>
    %78 = vector.multi_reduction <add>, %77, %cst_29 [1] : vector<32x32xf32> to vector<32xf32>
    %79 = vector.shape_cast %78 : vector<32xf32> to vector<32x1xf32>
    %80 = tpu.reciprocal %79 {approx = true} : vector<32x1xf32> -> vector<32x1xf32>
    %81 = vector.broadcast %80 : vector<32x1xf32> to vector<32x32xf32>
    %82 = arith.mulf %77, %81 : vector<32x32xf32>
    %83 = arith.truncf %82 : vector<32x32xf32> to vector<32x32xbf16>
    %cst_30 = arith.constant dense<0.000000e+00> : vector<32x32xf32>
    %84 = tpu.matmul %83, %70, %cst_30 {dimension_numbers = #tpu.dot_dimension_numbers<[1], [0], [0], [1], [0, 0, 1, 1], [], []>} : vector<32x32xbf16>, vector<32x32xbf16>, vector<32x32xf32> -> vector<32x32xf32>
    %85 = vector.extract_strided_slice %39 {offsets = [0, 64], sizes = [32, 32], strides = [1, 1]} : vector<32x384xf32> to vector<32x32xf32>
    %cst_31 = arith.constant 0.176776692 : f32
    %86 = vector.broadcast %cst_31 : f32 to vector<32x32xf32>
    %87 = arith.mulf %85, %86 : vector<32x32xf32>
    %88 = arith.truncf %87 : vector<32x32xf32> to vector<32x32xbf16>
    %89 = vector.extract_strided_slice %39 {offsets = [0, 192], sizes = [32, 32], strides = [1, 1]} : vector<32x384xf32> to vector<32x32xf32>
    %90 = arith.truncf %89 : vector<32x32xf32> to vector<32x32xbf16>
    %91 = vector.extract_strided_slice %39 {offsets = [0, 320], sizes = [32, 32], strides = [1, 1]} : vector<32x384xf32> to vector<32x32xf32>
    %92 = arith.truncf %91 : vector<32x32xf32> to vector<32x32xbf16>
    %cst_32 = arith.constant dense<0.000000e+00> : vector<32x32xf32>
    %93 = tpu.matmul %88, %90, %cst_32 {dimension_numbers = #tpu.dot_dimension_numbers<[1], [1], [0], [0], [0, 0, 1, 0], [], []>} : vector<32x32xbf16>, vector<32x32xbf16>, vector<32x32xf32> -> vector<32x32xf32>
    %94 = arith.addf %93, %40 : vector<32x32xf32>
    %cst_33 = arith.constant dense<0xFF800000> : vector<32xf32>
    %95 = vector.multi_reduction <maximumf>, %94, %cst_33 [1] : vector<32x32xf32> to vector<32xf32>
    %96 = vector.shape_cast %95 : vector<32xf32> to vector<32x1xf32>
    %97 = vector.broadcast %96 : vector<32x1xf32> to vector<32x32xf32>
    %98 = arith.subf %94, %97 : vector<32x32xf32>
    %99 = math.exp %98 : vector<32x32xf32>
    %cst_34 = arith.constant dense<0.000000e+00> : vector<32xf32>
    %100 = vector.multi_reduction <add>, %99, %cst_34 [1] : vector<32x32xf32> to vector<32xf32>
    %101 = vector.shape_cast %100 : vector<32xf32> to vector<32x1xf32>
    %102 = tpu.reciprocal %101 {approx = true} : vector<32x1xf32> -> vector<32x1xf32>
    %103 = vector.broadcast %102 : vector<32x1xf32> to vector<32x32xf32>
    %104 = arith.mulf %99, %103 : vector<32x32xf32>
    %105 = arith.truncf %104 : vector<32x32xf32> to vector<32x32xbf16>
    %cst_35 = arith.constant dense<0.000000e+00> : vector<32x32xf32>
    %106 = tpu.matmul %105, %92, %cst_35 {dimension_numbers = #tpu.dot_dimension_numbers<[1], [0], [0], [1], [0, 0, 1, 1], [], []>} : vector<32x32xbf16>, vector<32x32xbf16>, vector<32x32xf32> -> vector<32x32xf32>
    %107 = vector.extract_strided_slice %39 {offsets = [0, 96], sizes = [32, 32], strides = [1, 1]} : vector<32x384xf32> to vector<32x32xf32>
    %cst_36 = arith.constant 0.176776692 : f32
    %108 = vector.broadcast %cst_36 : f32 to vector<32x32xf32>
    %109 = arith.mulf %107, %108 : vector<32x32xf32>
    %110 = arith.truncf %109 : vector<32x32xf32> to vector<32x32xbf16>
    %111 = vector.extract_strided_slice %39 {offsets = [0, 224], sizes = [32, 32], strides = [1, 1]} : vector<32x384xf32> to vector<32x32xf32>
    %112 = arith.truncf %111 : vector<32x32xf32> to vector<32x32xbf16>
    %113 = vector.extract_strided_slice %39 {offsets = [0, 352], sizes = [32, 32], strides = [1, 1]} : vector<32x384xf32> to vector<32x32xf32>
    %114 = arith.truncf %113 : vector<32x32xf32> to vector<32x32xbf16>
    %cst_37 = arith.constant dense<0.000000e+00> : vector<32x32xf32>
    %115 = tpu.matmul %110, %112, %cst_37 {dimension_numbers = #tpu.dot_dimension_numbers<[1], [1], [0], [0], [0, 0, 1, 0], [], []>} : vector<32x32xbf16>, vector<32x32xbf16>, vector<32x32xf32> -> vector<32x32xf32>
    %116 = arith.addf %115, %40 : vector<32x32xf32>
    %cst_38 = arith.constant dense<0xFF800000> : vector<32xf32>
    %117 = vector.multi_reduction <maximumf>, %116, %cst_38 [1] : vector<32x32xf32> to vector<32xf32>
    %118 = vector.shape_cast %117 : vector<32xf32> to vector<32x1xf32>
    %119 = vector.broadcast %118 : vector<32x1xf32> to vector<32x32xf32>
    %120 = arith.subf %116, %119 : vector<32x32xf32>
    %121 = math.exp %120 : vector<32x32xf32>
    %cst_39 = arith.constant dense<0.000000e+00> : vector<32xf32>
    %122 = vector.multi_reduction <add>, %121, %cst_39 [1] : vector<32x32xf32> to vector<32xf32>
    %123 = vector.shape_cast %122 : vector<32xf32> to vector<32x1xf32>
    %124 = tpu.reciprocal %123 {approx = true} : vector<32x1xf32> -> vector<32x1xf32>
    %125 = vector.broadcast %124 : vector<32x1xf32> to vector<32x32xf32>
    %126 = arith.mulf %121, %125 : vector<32x32xf32>
    %127 = arith.truncf %126 : vector<32x32xf32> to vector<32x32xbf16>
    %cst_40 = arith.constant dense<0.000000e+00> : vector<32x32xf32>
    %128 = tpu.matmul %127, %114, %cst_40 {dimension_numbers = #tpu.dot_dimension_numbers<[1], [0], [0], [1], [0, 0, 1, 1], [], []>} : vector<32x32xbf16>, vector<32x32xbf16>, vector<32x32xf32> -> vector<32x32xf32>
    %129 = tpu.concatenate %62, %84, %106, %128 in 1 : vector<32x32xf32>, vector<32x32xf32>, vector<32x32xf32>, vector<32x32xf32> -> vector<32x128xf32>
    %130 = arith.truncf %129 : vector<32x128xf32> to vector<32x128xbf16>
    %c0_41 = arith.constant 0 : index
    %c0_42 = arith.constant 0 : index
    %c0_43 = arith.constant 0 : index
    %131 = vector.load %arg12[%c0_41, %c0_42, %c0_43] : memref<1x128x128xbf16, #tpu.memory_space<vmem>>, vector<1x128x128xbf16>
    %132 = vector.shape_cast %131 : vector<1x128x128xbf16> to vector<128x128xbf16>
    %cst_44 = arith.constant dense<0.000000e+00> : vector<32x128xf32>
    %133 = tpu.matmul %130, %132, %cst_44 {dimension_numbers = #tpu.dot_dimension_numbers<[1], [0], [0], [1], [0, 0, 1, 1], [], []>} : vector<32x128xbf16>, vector<128x128xbf16>, vector<32x128xf32> -> vector<32x128xf32>
    %c0_45 = arith.constant 0 : index
    %c0_46 = arith.constant 0 : index
    %c0_47 = arith.constant 0 : index
    %134 = vector.load %arg13[%c0_45, %c0_46, %c0_47] : memref<1x1x128xf32, #tpu.memory_space<vmem>>, vector<1x1x128xf32>
    %135 = vector.shape_cast %134 : vector<1x1x128xf32> to vector<1x128xf32>
    %136 = vector.broadcast %135 : vector<1x128xf32> to vector<32x128xf32>
    %137 = arith.addf %133, %136 : vector<32x128xf32>
    %138 = arith.addf %3, %137 : vector<32x128xf32>
    %c0_48 = arith.constant 0 : index
    %c0_49 = arith.constant 0 : index
    %c0_50 = arith.constant 0 : index
    %139 = vector.load %arg14[%c0_48, %c0_49, %c0_50] : memref<1x1x128xf32, #tpu.memory_space<vmem>>, vector<1x1x128xf32>
    %140 = vector.shape_cast %139 : vector<1x1x128xf32> to vector<1x128xf32>
    %c0_51 = arith.constant 0 : index
    %c0_52 = arith.constant 0 : index
    %c0_53 = arith.constant 0 : index
    %141 = vector.load %arg15[%c0_51, %c0_52, %c0_53] : memref<1x1x128xf32, #tpu.memory_space<vmem>>, vector<1x1x128xf32>
    %142 = vector.shape_cast %141 : vector<1x1x128xf32> to vector<1x128xf32>
    %cst_54 = arith.constant dense<0.000000e+00> : vector<32xf32>
    %143 = vector.multi_reduction <add>, %138, %cst_54 [1] : vector<32x128xf32> to vector<32xf32>
    %144 = vector.shape_cast %143 : vector<32xf32> to vector<32x1xf32>
    %cst_55 = arith.constant 1.280000e+02 : f32
    %145 = vector.broadcast %cst_55 : f32 to vector<32x1xf32>
    %146 = arith.divf %144, %145 : vector<32x1xf32>
    %147 = vector.broadcast %146 : vector<32x1xf32> to vector<32x128xf32>
    %148 = arith.subf %138, %147 : vector<32x128xf32>
    %149 = vector.broadcast %146 : vector<32x1xf32> to vector<32x128xf32>
    %150 = arith.subf %138, %149 : vector<32x128xf32>
    %151 = arith.mulf %148, %150 : vector<32x128xf32>
    %cst_56 = arith.constant dense<0.000000e+00> : vector<32xf32>
    %152 = vector.multi_reduction <add>, %151, %cst_56 [1] : vector<32x128xf32> to vector<32xf32>
    %153 = vector.shape_cast %152 : vector<32xf32> to vector<32x1xf32>
    %cst_57 = arith.constant 1.280000e+02 : f32
    %154 = vector.broadcast %cst_57 : f32 to vector<32x1xf32>
    %155 = arith.divf %153, %154 : vector<32x1xf32>
    %156 = vector.broadcast %146 : vector<32x1xf32> to vector<32x128xf32>
    %157 = arith.subf %138, %156 : vector<32x128xf32>
    %cst_58 = arith.constant 9.99999974E-6 : f32
    %158 = vector.broadcast %cst_58 : f32 to vector<32x1xf32>
    %159 = arith.addf %155, %158 : vector<32x1xf32>
    %160 = math.rsqrt %159 : vector<32x1xf32>
    %161 = vector.broadcast %160 : vector<32x1xf32> to vector<32x128xf32>
    %162 = arith.mulf %157, %161 : vector<32x128xf32>
    %163 = vector.broadcast %140 : vector<1x128xf32> to vector<32x128xf32>
    %164 = arith.mulf %162, %163 : vector<32x128xf32>
    %165 = vector.broadcast %142 : vector<1x128xf32> to vector<32x128xf32>
    %166 = arith.addf %164, %165 : vector<32x128xf32>
    %167 = arith.truncf %166 : vector<32x128xf32> to vector<32x128xbf16>
    %c0_59 = arith.constant 0 : index
    %c0_60 = arith.constant 0 : index
    %c0_61 = arith.constant 0 : index
    %168 = vector.load %arg16[%c0_59, %c0_60, %c0_61] : memref<1x128x256xbf16, #tpu.memory_space<vmem>>, vector<1x128x256xbf16>
    %169 = vector.shape_cast %168 : vector<1x128x256xbf16> to vector<128x256xbf16>
    %cst_62 = arith.constant dense<0.000000e+00> : vector<32x256xf32>
    %170 = tpu.matmul %167, %169, %cst_62 {dimension_numbers = #tpu.dot_dimension_numbers<[1], [0], [0], [1], [0, 0, 1, 1], [], []>} : vector<32x128xbf16>, vector<128x256xbf16>, vector<32x256xf32> -> vector<32x256xf32>
    %c0_63 = arith.constant 0 : index
    %c0_64 = arith.constant 0 : index
    %c0_65 = arith.constant 0 : index
    %171 = vector.load %arg17[%c0_63, %c0_64, %c0_65] : memref<1x1x256xf32, #tpu.memory_space<vmem>>, vector<1x1x256xf32>
    %172 = vector.shape_cast %171 : vector<1x1x256xf32> to vector<1x256xf32>
    %173 = vector.broadcast %172 : vector<1x256xf32> to vector<32x256xf32>
    %174 = arith.addf %170, %173 : vector<32x256xf32>
    %cst_66 = arith.constant 5.000000e-01 : f32
    %175 = vector.broadcast %cst_66 : f32 to vector<32x256xf32>
    %176 = arith.mulf %175, %174 : vector<32x256xf32>
    %cst_67 = arith.constant 4.471500e-02 : f32
    %177 = vector.broadcast %cst_67 : f32 to vector<32x256xf32>
    %178 = arith.mulf %177, %174 : vector<32x256xf32>
    %179 = arith.mulf %178, %174 : vector<32x256xf32>
    %180 = arith.mulf %179, %174 : vector<32x256xf32>
    %181 = arith.addf %174, %180 : vector<32x256xf32>
    %cst_68 = arith.constant 0.797884583 : f32
    %182 = vector.broadcast %cst_68 : f32 to vector<32x256xf32>
    %183 = arith.mulf %182, %181 : vector<32x256xf32>
    %184 = math.tanh %183 : vector<32x256xf32>
    %cst_69 = arith.constant 1.000000e+00 : f32
    %185 = vector.broadcast %cst_69 : f32 to vector<32x256xf32>
    %186 = arith.addf %185, %184 : vector<32x256xf32>
    %187 = arith.mulf %176, %186 : vector<32x256xf32>
    %188 = arith.truncf %187 : vector<32x256xf32> to vector<32x256xbf16>
    %c0_70 = arith.constant 0 : index
    %c0_71 = arith.constant 0 : index
    %c0_72 = arith.constant 0 : index
    %189 = vector.load %arg18[%c0_70, %c0_71, %c0_72] : memref<1x256x128xbf16, #tpu.memory_space<vmem>>, vector<1x256x128xbf16>
    %190 = vector.shape_cast %189 : vector<1x256x128xbf16> to vector<256x128xbf16>
    %cst_73 = arith.constant dense<0.000000e+00> : vector<32x128xf32>
    %191 = tpu.matmul %188, %190, %cst_73 {dimension_numbers = #tpu.dot_dimension_numbers<[1], [0], [0], [1], [0, 0, 1, 1], [], []>} : vector<32x256xbf16>, vector<256x128xbf16>, vector<32x128xf32> -> vector<32x128xf32>
    %c0_74 = arith.constant 0 : index
    %c0_75 = arith.constant 0 : index
    %c0_76 = arith.constant 0 : index
    %192 = vector.load %arg19[%c0_74, %c0_75, %c0_76] : memref<1x1x128xf32, #tpu.memory_space<vmem>>, vector<1x1x128xf32>
    %193 = vector.shape_cast %192 : vector<1x1x128xf32> to vector<1x128xf32>
    %194 = vector.broadcast %193 : vector<1x128xf32> to vector<32x128xf32>
    %195 = arith.addf %191, %194 : vector<32x128xf32>
    %196 = arith.addf %138, %195 : vector<32x128xf32>
    %c0_77 = arith.constant 0 : index
    %c0_78 = arith.constant 0 : index
    %197 = vector.load %arg20[%c0_77, %c0_78] : memref<32x128xf32, #tpu.memory_space<vmem>>, vector<32x128xf32>
    tpu.vector_store %arg20[%c0_77, %c0_78], %196 {strides = array<i32>} : memref<32x128xf32, #tpu.memory_space<vmem>>, vector<32x128xf32>,
    %c2_i32 = arith.constant 2 : i32
    %198 = arith.cmpi eq, %arg0, %c2_i32 : i32
    %199 = arith.extui %198 : i1 to i32
    %c0_i32_79 = arith.constant 0 : i32
    %200 = arith.cmpi ne, %199, %c0_i32_79 : i32
    scf.if %200 {
      %c0_80 = arith.constant 0 : index
      %c0_81 = arith.constant 0 : index
      %201 = vector.load %arg20[%c0_80, %c0_81] : memref<32x128xf32, #tpu.memory_space<vmem>>, vector<32x128xf32>
      %c0_82 = arith.constant 0 : index
      %c0_83 = arith.constant 0 : index
      %202 = vector.load %arg6[%c0_82, %c0_83] : memref<1x128xf32, #tpu.memory_space<vmem>>, vector<1x128xf32>
      %c0_84 = arith.constant 0 : index
      %c0_85 = arith.constant 0 : index
      %203 = vector.load %arg7[%c0_84, %c0_85] : memref<1x128xf32, #tpu.memory_space<vmem>>, vector<1x128xf32>
      %cst_86 = arith.constant dense<0.000000e+00> : vector<32xf32>
      %204 = vector.multi_reduction <add>, %201, %cst_86 [1] : vector<32x128xf32> to vector<32xf32>
      %205 = vector.shape_cast %204 : vector<32xf32> to vector<32x1xf32>
      %cst_87 = arith.constant 1.280000e+02 : f32
      %206 = vector.broadcast %cst_87 : f32 to vector<32x1xf32>
      %207 = arith.divf %205, %206 : vector<32x1xf32>
      %208 = vector.broadcast %207 : vector<32x1xf32> to vector<32x128xf32>
      %209 = arith.subf %201, %208 : vector<32x128xf32>
      %210 = vector.broadcast %207 : vector<32x1xf32> to vector<32x128xf32>
      %211 = arith.subf %201, %210 : vector<32x128xf32>
      %212 = arith.mulf %209, %211 : vector<32x128xf32>
      %cst_88 = arith.constant dense<0.000000e+00> : vector<32xf32>
      %213 = vector.multi_reduction <add>, %212, %cst_88 [1] : vector<32x128xf32> to vector<32xf32>
      %214 = vector.shape_cast %213 : vector<32xf32> to vector<32x1xf32>
      %cst_89 = arith.constant 1.280000e+02 : f32
      %215 = vector.broadcast %cst_89 : f32 to vector<32x1xf32>
      %216 = arith.divf %214, %215 : vector<32x1xf32>
      %217 = vector.broadcast %207 : vector<32x1xf32> to vector<32x128xf32>
      %218 = arith.subf %201, %217 : vector<32x128xf32>
      %cst_90 = arith.constant 9.99999974E-6 : f32
      %219 = vector.broadcast %cst_90 : f32 to vector<32x1xf32>
      %220 = arith.addf %216, %219 : vector<32x1xf32>
      %221 = math.rsqrt %220 : vector<32x1xf32>
      %222 = vector.broadcast %221 : vector<32x1xf32> to vector<32x128xf32>
      %223 = arith.mulf %218, %222 : vector<32x128xf32>
      %224 = vector.broadcast %202 : vector<1x128xf32> to vector<32x128xf32>
      %225 = arith.mulf %223, %224 : vector<32x128xf32>
      %226 = vector.broadcast %203 : vector<1x128xf32> to vector<32x128xf32>
      %227 = arith.addf %225, %226 : vector<32x128xf32>
      %c0_91 = arith.constant 0 : index
      %c0_92 = arith.constant 0 : index
      %228 = vector.load %arg20[%c0_91, %c0_92] : memref<32x128xf32, #tpu.memory_space<vmem>>, vector<32x128xf32>
      tpu.vector_store %arg20[%c0_91, %c0_92], %227 {strides = array<i32>} : memref<32x128xf32, #tpu.memory_space<vmem>>, vector<32x128xf32>,
    } else {
    }
    return
  }
  func.func @transform_0(%arg0: i32) -> (i32, i32) {
    %c0_i32 = arith.constant 0 : i32
    %c0_i32_0 = arith.constant 0 : i32
    %c0_i32_1 = arith.constant 0 : i32
    return %c0_i32, %c0_i32_0 : i32, i32
  }
  func.func @transform_1(%arg0: i32) -> (i32, i32) {
    %c0_i32 = arith.constant 0 : i32
    %c0_i32_0 = arith.constant 0 : i32
    %c0_i32_1 = arith.constant 0 : i32
    return %c0_i32, %c0_i32_0 : i32, i32
  }
  func.func @transform_2(%arg0: i32) -> (i32, i32) {
    %c0_i32 = arith.constant 0 : i32
    %c0_i32_0 = arith.constant 0 : i32
    %c0_i32_1 = arith.constant 0 : i32
    return %c0_i32, %c0_i32_0 : i32, i32
  }
  func.func @transform_3(%arg0: i32) -> (i32, i32) {
    %c0_i32 = arith.constant 0 : i32
    %c0_i32_0 = arith.constant 0 : i32
    %c0_i32_1 = arith.constant 0 : i32
    return %c0_i32, %c0_i32_0 : i32, i32
  }
  func.func @transform_4(%arg0: i32) -> (i32, i32) {
    %c0_i32 = arith.constant 0 : i32
    %c0_i32_0 = arith.constant 0 : i32
    %c0_i32_1 = arith.constant 0 : i32
    return %c0_i32, %c0_i32_0 : i32, i32
  }
  func.func @transform_5(%arg0: i32) -> (i32, i32) {
    %c0_i32 = arith.constant 0 : i32
    %c0_i32_0 = arith.constant 0 : i32
    %c0_i32_1 = arith.constant 0 : i32
    return %c0_i32, %c0_i32_0 : i32, i32
  }
  func.func @transform_6(%arg0: i32) -> (i32, i32) {
    %c0_i32 = arith.constant 0 : i32
    %c0_i32_0 = arith.constant 0 : i32
    %c0_i32_1 = arith.constant 0 : i32
    return %c0_i32, %c0_i32_0 : i32, i32
  }
  func.func @transform_7(%arg0: i32) -> (i32, i32, i32) {
    %c0_i32 = arith.constant 0 : i32
    %c0_i32_0 = arith.constant 0 : i32
    %c0_i32_1 = arith.constant 0 : i32
    return %arg0, %c0_i32, %c0_i32_0 : i32, i32, i32
  }
  func.func @transform_8(%arg0: i32) -> (i32, i32, i32) {
    %c0_i32 = arith.constant 0 : i32
    %c0_i32_0 = arith.constant 0 : i32
    %c0_i32_1 = arith.constant 0 : i32
    return %arg0, %c0_i32, %c0_i32_0 : i32, i32, i32
  }
  func.func @transform_9(%arg0: i32) -> (i32, i32, i32) {
    %c0_i32 = arith.constant 0 : i32
    %c0_i32_0 = arith.constant 0 : i32
    %c0_i32_1 = arith.constant 0 : i32
    return %arg0, %c0_i32, %c0_i32_0 : i32, i32, i32
  }
  func.func @transform_10(%arg0: i32) -> (i32, i32, i32) {
    %c0_i32 = arith.constant 0 : i32
    %c0_i32_0 = arith.constant 0 : i32
    %c0_i32_1 = arith.constant 0 : i32
    return %arg0, %c0_i32, %c0_i32_0 : i32, i32, i32
  }
  func.func @transform_11(%arg0: i32) -> (i32, i32, i32) {
    %c0_i32 = arith.constant 0 : i32
    %c0_i32_0 = arith.constant 0 : i32
    %c0_i32_1 = arith.constant 0 : i32
    return %arg0, %c0_i32, %c0_i32_0 : i32, i32, i32
  }
  func.func @transform_12(%arg0: i32) -> (i32, i32, i32) {
    %c0_i32 = arith.constant 0 : i32
    %c0_i32_0 = arith.constant 0 : i32
    %c0_i32_1 = arith.constant 0 : i32
    return %arg0, %c0_i32, %c0_i32_0 : i32, i32, i32
  }
  func.func @transform_13(%arg0: i32) -> (i32, i32, i32) {
    %c0_i32 = arith.constant 0 : i32
    %c0_i32_0 = arith.constant 0 : i32
    %c0_i32_1 = arith.constant 0 : i32
    return %arg0, %c0_i32, %c0_i32_0 : i32, i32, i32
  }
  func.func @transform_14(%arg0: i32) -> (i32, i32, i32) {
    %c0_i32 = arith.constant 0 : i32
    %c0_i32_0 = arith.constant 0 : i32
    %c0_i32_1 = arith.constant 0 : i32
    return %arg0, %c0_i32, %c0_i32_0 : i32, i32, i32
  }
  func.func @transform_15(%arg0: i32) -> (i32, i32, i32) {
    %c0_i32 = arith.constant 0 : i32
    %c0_i32_0 = arith.constant 0 : i32
    %c0_i32_1 = arith.constant 0 : i32
    return %arg0, %c0_i32, %c0_i32_0 : i32, i32, i32
  }
  func.func @transform_16(%arg0: i32) -> (i32, i32, i32) {
    %c0_i32 = arith.constant 0 : i32
    %c0_i32_0 = arith.constant 0 : i32
    %c0_i32_1 = arith.constant 0 : i32
    return %arg0, %c0_i32, %c0_i32_0 : i32, i32, i32
  }
  func.func @transform_17(%arg0: i32) -> (i32, i32, i32) {
    %c0_i32 = arith.constant 0 : i32
    %c0_i32_0 = arith.constant 0 : i32
    %c0_i32_1 = arith.constant 0 : i32
    return %arg0, %c0_i32, %c0_i32_0 : i32, i32, i32
  }
  func.func @transform_18(%arg0: i32) -> (i32, i32, i32) {
    %c0_i32 = arith.constant 0 : i32
    %c0_i32_0 = arith.constant 0 : i32
    %c0_i32_1 = arith.constant 0 : i32
    return %arg0, %c0_i32, %c0_i32_0 : i32, i32, i32
  }
  func.func @transform_19(%arg0: i32) -> (i32, i32) {
    %c0_i32 = arith.constant 0 : i32
    %c0_i32_0 = arith.constant 0 : i32
    %c0_i32_1 = arith.constant 0 : i32
    return %c0_i32, %c0_i32_0 : i32, i32
  }
}

</mosaic_0001>

<bundles_post_ra>
// kernel: vision_transformer.1
= control target key start
LH: loop header
LB: loop body
LE: loop exit
PB: predicated region body
PF: predicated region fallthrough
CT: control target
= control target key end

     0   :  { %s4853_s0 = inlined_call_operand.vmem [shape: f32[32,640], index: 0, kind: input, shape index: {}]   ;;  %s4854_s1 = inlined_call_operand.vmem [shape: bf16[640,128], index: 1, kind: input, shape index: {}]   ;;  %s4855_s2 = inlined_call_operand.vmem [shape: f32[1,128], index: 2, kind: input, shape index: {}]   ;;  %s4856_s3 = inlined_call_operand.vmem [shape: f32[32,128], index: 3, kind: input, shape index: {}]   ;;  %s4857_s4 = inlined_call_operand.vmem [shape: f32[32,32], index: 4, kind: input, shape index: {}]   ;;  %s4858_s5 = inlined_call_operand.vmem [shape: f32[1,128], index: 5, kind: input, shape index: {}]   ;;  %s4859_s6 = inlined_call_operand.vmem [shape: f32[1,128], index: 6, kind: input, shape index: {}]   ;;  %s4860_s7 = inlined_call_operand.vmem [shape: f32[3,1,128], index: 7, kind: input, shape index: {}]   ;;  %s4861_s8 = inlined_call_operand.vmem [shape: f32[3,1,128], index: 8, kind: input, shape index: {}]   ;;  %s4862_s9 = inlined_call_operand.vmem [shape: bf16[3,128,384], index: 9, kind: input, shape index: {}]   ;;  %s4863_s10 = inlined_call_operand.vmem [shape: f32[3,1,384], index: 10, kind: input, shape index: {}]   ;;  %s4864_s11 = inlined_call_operand.vmem [shape: bf16[3,128,128], index: 11, kind: input, shape index: {}]   ;;  %s4865_s12 = inlined_call_operand.vmem [shape: f32[3,1,128], index: 12, kind: input, shape index: {}]   ;;  %s4866_s13 = inlined_call_operand.vmem [shape: f32[3,1,128], index: 13, kind: input, shape index: {}]   ;;  %s4867_s14 = inlined_call_operand.vmem [shape: f32[3,1,128], index: 14, kind: input, shape index: {}]   ;;  %s4868_s15 = inlined_call_operand.vmem [shape: bf16[3,128,256], index: 15, kind: input, shape index: {}]   ;;  %s4869_s16 = inlined_call_operand.vmem [shape: f32[3,1,256], index: 16, kind: input, shape index: {}]   ;;  %s4870_s17 = inlined_call_operand.vmem [shape: bf16[3,256,128], index: 17, kind: input, shape index: {}]   ;;  %s4871_s18 = inlined_call_operand.vmem [shape: f32[3,1,128], index: 18, kind: input, shape index: {}]   ;;  %s4872_s19 = inlined_call_operand.hbm [shape: f32[32,128], index: 19, kind: output, shape index: {}]  }
   0x1   :  { %4879 = sst [smem:[#allocation6_spill]] %s4853_s0 }
   0x2   :  { %4880 = sst [smem:[#allocation7_spill]] %s4854_s1 }
   0x3   :  { %4881 = sst [smem:[#allocation8_spill]] %s4855_s2 }
   0x4   :  { %4882 = sst [smem:[#allocation9_spill]] %s4856_s3 }
   0x5   :  { %4883 = sst [smem:[#allocation10_spill]] %s4857_s4 }
   0x6   :  { %4884 = sst [smem:[#allocation11_spill]] %s4858_s5 }
   0x7   :  { %4885 = sst [smem:[#allocation12_spill]] %s4859_s6 }
   0x8   :  { %4886 = sst [smem:[#allocation13_spill]] %s4862_s9 }
   0x9   :  { %4887 = sst [smem:[#allocation14_spill]] %s4864_s11 }
   0xa   :  { %4888 = sst [smem:[#allocation15_spill]] %s4872_s19 }
   0xb   :  { %24 = vsyncpa [#allocation3], 0  ;;  %s4130_s0 = smov 0  }
   0xc LB: > { %4889 = sst [smem:[#allocation5_spill]] %s4021_s0  ;;  %s4136_s30 = sadd.s32 4294967295, %s4021_s0   ;;  %s4021_s0 = sphi %s4130_s0, %s30_s0  }
   0xd   : > { %p3279_p0 = scmp.ge.s32.totalorder %s4021_s0, 1  ;;  %p629_p1 = scmp.lt.s32.totalorder %s4021_s0, 4 }
   0xf   : > { %p630_p2 = pnand %p3279_p0, %p629_p1 }
  0x10   : > { %p721_p3 = scmp.lt.s32.totalorder (!%p630_p2), %s4136_s30, 2  ;;  %s4890_s11 = sld [smem:[#allocation14_spill]] (!%p630_p2) }
  0x11   : > { %633 = sbr.rel (%p630_p2) target bundleno = 4254 (0x109e), region = 96  ;;  %s4891_s9 = sld [smem:[#allocation13_spill]] (!%p630_p2) }
  0x12   : > { %p3288_p4 = scmp.ne.s32.totalorder (!%p630_p2), %s4136_s30, 0 }
  0x18   : > { %s4142_s20 = scalar_select %p721_p3, %s4136_s30, 2 }
  0x19   : > { %771 = sbr.rel (%p3288_p4) target bundleno = 323 (0x143), region = 100  ;;  %s4893_s5 = sld [smem:[#allocation6_spill]] (!%p3288_p4) }
  0x1a   : > { %s3704_s25 = smul.u32 192, %s4142_s20  ;;  %s3423_s3 = sshll.u32 %s4142_s20, 6 }
  0x1b   : > { %s3705_s26 = smul.u32 3, %s4142_s20  ;;  %s4158_s29 = scalar_lea.vmem %s4890_s11, %s3423_s3 }
  0x1c   : > { %s4163_s0 = scalar_lea.vmem %s4891_s9, %s3704_s25  ;;  %s3424_s21 = sshll.u32 %s4142_s20, 7 }
  0x1d   : > { %s4172_s24 = scalar_lea.vmem %s4863_s10, %s3705_s26  ;;  %s4186_s9 = scalar_lea.vmem %s4868_s15, %s3424_s21 }
  0x1e   : > { %s3285_s19 = sshll.u32 %s4142_s20, 1  ;;  %s4197_s4 = scalar_lea.vmem %s4870_s17, %s3424_s21 }
  0x1f   : > { %s4192_s26 = scalar_lea.vmem %s4869_s16, %s3285_s19  ;;  %s766_s28 = scalar_lea.vmem %s4871_s18, %s4142_s20  ;;  %v773_v31 = vld [vmem:[%s4893_s5 + $0x8] sm:$0xff] (!%p3288_p4)  ;;  %v778_v32 = vld [vmem:[%s4893_s5 + $0x30] sm:$0xff] (!%p3288_p4)  ;;  %v772_v35 = vld [vmem:[%s4893_s5] sm:$0xff] (!%p3288_p4) }
  0x20   : > { %s4892_s11 = sld [smem:[#allocation7_spill]]  ;;  %v793_v33 = vpack.c.bf16 %v778_v32, %v773_v31  ;;  %v777_v36 = vld [vmem:[%s4893_s5 + $0x28] sm:$0xff]  ;;  %v775_v39 = vld [vmem:[%s4893_s5 + $0x18] sm:$0xff]  ;;  %v780_v40 = vld [vmem:[%s4893_s5 + $0x40] sm:$0xff]  ;;  %s4894_s2 = sld [smem:[#allocation8_spill]] }
  0x21   : > { %v792_v37 = vpack.c.bf16 %v777_v36, %v772_v35  ;;  %v795_v41 = vpack.c.bf16 %v780_v40, %v775_v39  ;;  %v774_v42 = vld [vmem:[%s4893_s5 + $0x10] sm:$0xff]  ;;  %v779_v43 = vld [vmem:[%s4893_s5 + $0x38] sm:$0xff]  ;;  %v788_v48 = vld [vmem:[%s4893_s5 + $0x80] sm:$0xff]  ;;  %s4895_s25 = sld [smem:[#allocation9_spill]] }
  0x22   : > { %1161 = vmatprep.mubr.bf16.mxu0 %v793_v33  ;;  %v794_v44 = vpack.c.bf16 %v779_v43, %v774_v42  ;;  %v783_v47 = vld [vmem:[%s4893_s5 + $0x58] sm:$0xff]  ;;  %v782_v51 = vld [vmem:[%s4893_s5 + $0x50] sm:$0xff]  ;;  %v785_v54 = vld [vmem:[%s4893_s5 + $0x68] sm:$0xff] }
  0x23   : > { %1210 = vmatprep.mubr.bf16.mxu1 %v795_v41  ;;  %v798_v50 = vpack.c.bf16 %v788_v48, %v783_v47  ;;  %v787_v52 = vld [vmem:[%s4893_s5 + $0x78] sm:$0xff]  ;;  %v790_v55 = vld [vmem:[%s4893_s5 + $0x90] sm:$0xff]  ;;  %v784_v56 = vld [vmem:[%s4893_s5 + $0x60] sm:$0xff] }
  0x24   : > { %v797_v53 = vpack.c.bf16 %v787_v52, %v782_v51  ;;  %v800_v57 = vpack.c.bf16 %v790_v55, %v785_v54  ;;  %v789_v58 = vld [vmem:[%s4893_s5 + $0x88] sm:$0xff]  ;;  %v776_v60 = vld [vmem:[%s4893_s5 + $0x20] sm:$0xff] }
  0x25   : > { %v799_v59 = vpack.c.bf16 %v789_v58, %v784_v56  ;;  %v781_v61 = vld [vmem:[%s4893_s5 + $0x48] sm:$0xff] }
  0x26   : > { %v3727_v0 = vld [vmem:[%s4892_s11 + $0x40] sm:$0xff]   ;;  %v3731_v4 = vld [vmem:[%s4892_s11 + $0x48] sm:$0xff]   ;;  %v3735_v8 = vld [vmem:[%s4892_s11 + $0x50] sm:$0xff]   ;;  %v796_v63 = vpack.c.bf16 %v781_v61, %v776_v60 }
  0x27   : > { %v3728_v1 = vld [vmem:[%s4892_s11] sm:$0xff]   ;;  %3426 = vmatprep.subr.bf16.mxu0 %v3727_v0  ;;  %v3732_v5 = vld [vmem:[%s4892_s11 + $0x8] sm:$0xff]   ;;  %v3736_v9 = vld [vmem:[%s4892_s11 + $0x10] sm:$0xff]  }
  0x28   : > { %v3729_v2 = vld [vmem:[%s4892_s11 + $0xc0] sm:$0xff]   ;;  %3427 = vmatpush3.bf16.msra.mxu0 %v3728_v1  ;;  %v3733_v6 = vld [vmem:[%s4892_s11 + $0xc8] sm:$0xff]   ;;  %v3737_v10 = vld [vmem:[%s4892_s11 + $0xd0] sm:$0xff]  }
  0x29   : > { %v3730_v3 = vld [vmem:[%s4892_s11 + $0x80] sm:$0xff]   ;;  %3454 = vmatprep.subr.bf16.mxu1 %v3729_v2  ;;  %3428 = vmatprep.subr.bf16.mxu0 %v3731_v4  ;;  %v3734_v7 = vld [vmem:[%s4892_s11 + $0x88] sm:$0xff]   ;;  %v3738_v11 = vld [vmem:[%s4892_s11 + $0x90] sm:$0xff]  }
  0x2a   : > { %3455 = vmatpush3.bf16.msra.mxu1 %v3730_v3  ;;  %v3739_v12 = vld [vmem:[%s4892_s11 + $0x58] sm:$0xff]   ;;  %v3743_v16 = vld [vmem:[%s4892_s11 + $0x60] sm:$0xff]   ;;  %v3747_v20 = vld [vmem:[%s4892_s11 + $0x68] sm:$0xff]  }
  0x2b   : > { %3456 = vmatprep.subr.bf16.mxu1 %v3733_v6  ;;  %v3740_v13 = vld [vmem:[%s4892_s11 + $0x18] sm:$0xff]   ;;  %v3744_v17 = vld [vmem:[%s4892_s11 + $0x20] sm:$0xff]   ;;  %v3748_v21 = vld [vmem:[%s4892_s11 + $0x28] sm:$0xff]  }
  0x2c   : > { %3429 = vmatpush3.bf16.msra.mxu0 %v3732_v5  ;;  %v3741_v14 = vld [vmem:[%s4892_s11 + $0xd8] sm:$0xff]   ;;  %v3745_v18 = vld [vmem:[%s4892_s11 + $0xe0] sm:$0xff]   ;;  %v3749_v22 = vld [vmem:[%s4892_s11 + $0xe8] sm:$0xff]  }
  0x2d   : > { %3430 = vmatprep.subr.bf16.mxu0 %v3735_v8  ;;  %v3742_v15 = vld [vmem:[%s4892_s11 + $0x98] sm:$0xff]   ;;  %v3746_v19 = vld [vmem:[%s4892_s11 + $0xa0] sm:$0xff]   ;;  %v3750_v23 = vld [vmem:[%s4892_s11 + $0xa8] sm:$0xff]  }
  0x2e   : > { %3457 = vmatpush3.bf16.msra.mxu1 %v3734_v7  ;;  %v3751_v24 = vld [vmem:[%s4892_s11 + $0x70] sm:$0xff]   ;;  %v3755_v28 = vld [vmem:[%s4892_s11 + $0x78] sm:$0xff]   ;;  %v3759_v38 = vld [vmem:[%s4892_s11 + $0x100] sm:$0xff]  }
  0x2f   : > { %3458 = vmatprep.subr.bf16.mxu1 %v3737_v10  ;;  %v3752_v25 = vld [vmem:[%s4892_s11 + $0x30] sm:$0xff]   ;;  %v3756_v29 = vld [vmem:[%s4892_s11 + $0x38] sm:$0xff]   ;;  %v3760_v45 = vld [vmem:[%s4892_s11 + $0x108] sm:$0xff]  }
  0x30   : > { %3431 = vmatpush3.bf16.msra.mxu0 %v3736_v9  ;;  %v3753_v26 = vld [vmem:[%s4892_s11 + $0xf0] sm:$0xff]   ;;  %v3757_v30 = vld [vmem:[%s4892_s11 + $0xf8] sm:$0xff]   ;;  %v3763_v62 = vld [vmem:[%s4892_s11 + $0x120] sm:$0xff]  }
  0x31   : > { %3432 = vmatprep.subr.bf16.mxu0 %v3739_v12  ;;  %v3754_v27 = vld [vmem:[%s4892_s11 + $0xb0] sm:$0xff]   ;;  %v3758_v34 = vld [vmem:[%s4892_s11 + $0xb8] sm:$0xff]   ;;  %v3764_v0 = vld [vmem:[%s4892_s11 + $0x128] sm:$0xff]  }
  0x32   : > { %3459 = vmatpush3.bf16.msra.mxu1 %v3738_v11  ;;  %v3761_v46 = vld [vmem:[%s4892_s11 + $0x110] sm:$0xff]   ;;  %v3762_v49 = vld [vmem:[%s4892_s11 + $0x118] sm:$0xff]   ;;  %v3289_v7 = vld [vmem:[%s4894_s2] ss:$0 sm:$0xff] }
  0x33   : > { %3460 = vmatprep.subr.bf16.mxu1 %v3741_v14  ;;  %v3765_v1 = vld [vmem:[%s4892_s11 + $0x130] sm:$0xff]   ;;  %v3766_v2 = vld [vmem:[%s4892_s11 + $0x138] sm:$0xff]   ;;  %v1276_v43 = vld [vmem:[%s4895_s25] sm:$0xff] }
  0x34   : > { %3433 = vmatpush3.bf16.msra.mxu0 %v3740_v13  ;;  %v786_v3 = vld [vmem:[%s4893_s5 + $0x70] sm:$0xff]  ;;  %v791_v4 = vld [vmem:[%s4893_s5 + $0x98] sm:$0xff] }
  0x35   : > { %3434 = vmatprep.subr.bf16.mxu0 %v3743_v16  ;;  %v801_v5 = vpack.c.bf16 %v791_v4, %v786_v3  ;;  %v1278_v40 = vld [vmem:[%s4895_s25 + $0x10] sm:$0xff] }
  0x36   : > { %3461 = vmatpush3.bf16.msra.mxu1 %v3742_v15 }
  0x37   : > { %3462 = vmatprep.subr.bf16.mxu1 %v3745_v18 }
  0x38   : > { %3435 = vmatpush3.bf16.msra.mxu0 %v3744_v17 }
  0x39   : > { %3436 = vmatprep.subr.bf16.mxu0 %v3747_v20 }
  0x3a   : > { %3463 = vmatpush3.bf16.msra.mxu1 %v3746_v19 }
  0x3b   : > { %3464 = vmatprep.subr.bf16.mxu1 %v3749_v22 }
  0x3c   : > { %3437 = vmatpush3.bf16.msra.mxu0 %v3748_v21 }
  0x3d   : > { %3438 = vmatprep.subr.bf16.mxu0 %v3751_v24 }
  0x3e   : > { %3465 = vmatpush3.bf16.msra.mxu1 %v3750_v23 }
  0x3f   : > { %3466 = vmatprep.subr.bf16.mxu1 %v3753_v26 }
  0x40   : > { %3439 = vmatpush3.bf16.msra.mxu0 %v3752_v25 }
  0x41   : > { %3440 = vmatprep.subr.bf16.mxu0 %v3755_v28 }
  0x42   : > { %3467 = vmatpush3.bf16.msra.mxu1 %v3754_v27 }
  0x43   : > { %3468 = vmatprep.subr.bf16.mxu1 %v3757_v30 }
  0x44   : > { %3441 = vmatpush3.bf16.msra.mxu0 %v3756_v29 }
  0x45   : > { %3572 = vmatprep.subr.bf16.mxu0 %v3759_v38 }
  0x46   : > { %3469 = vmatpush3.bf16.msra.mxu1 %v3758_v34 }
  0x47   : > { %1162 = vmatmul.mubr.bf16.vlgmr.msra.gmra.mrb[0].mxu0 %v792_v37 }
  0x48   : > { %3573 = vmatpush3.bf16.msra.mxu0 %v3759_v38  ;;  %1169 = vmatprep.mubr.bf16.mxu0 %v798_v50  ;;  %v1277_v50 = vld [vmem:[%s4895_s25 + $0x8] sm:$0xff] }
  0x49   : > { %1211 = vmatmul.mubr.bf16.vlgmr.msra.gmra.mrb[0].mxu1 %v794_v44  ;;  %3574 = vmatprep.subr.bf16.mxu0 %v3760_v45 }
  0x4a   : > { %1218 = vmatprep.mubr.bf16.mxu1 %v800_v57 }
  0x4c   : > { %3575 = vmatpush3.bf16.msra.mxu0 %v3760_v45 }
  0x4d   : > { %3576 = vmatprep.subr.bf16.mxu0 %v3761_v46 }
  0x4f   : > { %1170 = vmatmul.mubr.bf16.gmra.mrb[4].mxu0 %v797_v53 }
  0x50   : > { %3577 = vmatpush3.bf16.msra.mxu0 %v3761_v46  ;;  %3588 = vmatprep.mubr.bf16.mxu0 %v796_v63  ;;  %v1279_v46 = vld [vmem:[%s4895_s25 + $0x18] sm:$0xff] }
  0x51   : > { %3578 = vmatprep.subr.bf16.mxu0 %v3762_v49  ;;  %1219 = vmatmul.mubr.bf16.gmra.mrb[4].mxu1 %v799_v59 }
  0x54   : > { %3579 = vmatpush3.bf16.msra.mxu0 %v3762_v49 }
  0x55   : > { %3580 = vmatprep.subr.bf16.mxu0 %v3763_v62 }
  0x58   : > { %3581 = vmatpush3.bf16.msra.mxu0 %v3763_v62 }
  0x59   : > { %3582 = vmatprep.subr.bf16.mxu0 %v3764_v0 }
  0x5c   : > { %3583 = vmatpush3.bf16.msra.mxu0 %v3764_v0 }
  0x5d   : > { %3584 = vmatprep.subr.bf16.mxu0 %v3765_v1 }
  0x60   : > { %3585 = vmatpush3.bf16.msra.mxu0 %v3765_v1 }
  0x61   : > { %3586 = vmatprep.subr.bf16.mxu0 %v3766_v2 }
  0x64   : > { %3587 = vmatpush3.bf16.msra.mxu0 %v3766_v2 }
  0x67   : > { %3589 = vmatmul.mubr.bf16.vlgmr.msra.gmra.mrb[8].mxu0 %v801_v5 }
 0x11a   : > { %v3442_v6 = vpop.f32.mrb[0].mxu0 }
 0x11b   : > { %v3443_v8 = vpop.f32.mrb[1].mxu0 }
 0x11c   : > { %v3444_v9 = vadd.f32 %v3443_v8, %v3442_v6  ;;  %v3445_v10 = vpop.f32.mrb[2].mxu0  ;;  %v3470_v11 = vpop.f32.mrb[0].mxu1 }
 0x11d   : > { %v3446_v12 = vpop.f32.mrb[3].mxu0  ;;  %v3471_v13 = vpop.f32.mrb[1].mxu1 }
 0x11e   : > { %v1164_v14 = vadd.f32 %v3444_v9, %v3289_v7  ;;  %v3447_v15 = vadd.f32 %v3446_v12, %v3445_v10  ;;  %v3472_v16 = vadd.f32 %v3471_v13, %v3470_v11  ;;  %v3473_v17 = vpop.f32.mrb[2].mxu1 }
 0x11f   : > { %v3474_v18 = vpop.f32.mrb[3].mxu1 }
 0x120   : > { %v1167_v19 = vadd.f32 %v3447_v15, %v3289_v7  ;;  %v3475_v20 = vadd.f32 %v3474_v18, %v3473_v17  ;;  %v1213_v21 = vadd.f32 %v3472_v16, %v1164_v14 }
 0x122   : > { %v3448_v22 = vpop.f32.mrb[4].mxu0  ;;  %v1216_v23 = vadd.f32 %v3475_v20, %v1167_v19 }
 0x123   : > { %v3449_v24 = vpop.f32.mrb[5].mxu0 }
 0x124   : > { %v3450_v25 = vadd.f32 %v3449_v24, %v3448_v22  ;;  %v3451_v26 = vpop.f32.mrb[6].mxu0  ;;  %v3476_v27 = vpop.f32.mrb[4].mxu1 }
 0x125   : > { %v3452_v28 = vpop.f32.mrb[7].mxu0  ;;  %v3477_v29 = vpop.f32.mrb[5].mxu1 }
 0x126   : > { %v1172_v30 = vadd.f32 %v3450_v25, %v3289_v7  ;;  %v3453_v31 = vadd.f32 %v3452_v28, %v3451_v26  ;;  %v3478_v32 = vadd.f32 %v3477_v29, %v3476_v27  ;;  %v3479_v33 = vpop.f32.mrb[6].mxu1 }
 0x127   : > { %v3480_v34 = vpop.f32.mrb[7].mxu1 }
 0x128   : > { %v1175_v35 = vadd.f32 %v3453_v31, %v3289_v7  ;;  %v3481_v36 = vadd.f32 %v3480_v34, %v3479_v33  ;;  %v1221_v37 = vadd.f32 %v3478_v32, %v1172_v30 }
 0x12a   : > { %v1224_v38 = vadd.f32 %v3481_v36, %v1175_v35 }
 0x13a   : > { %v3590_v39 = vpop.f32.mrb[8].mxu0 }
 0x13b   : > { %v1270_v41 = vadd.f32 %v3590_v39, %v1221_v37  ;;  %v1261_v42 = vpop.f32.mrb[9].mxu0 }
 0x13c   : > { %v1262_v44 = vadd.f32 %v1261_v42, %v1213_v21  ;;  %v3591_v45 = vpop.f32.mrb[10].mxu0 }
 0x13d   : > { %v1282_v47 = vadd.f32 %v1278_v40, %v1270_v41  ;;  %v1273_v48 = vadd.f32 %v3591_v45, %v1224_v38  ;;  %v1264_v49 = vpop.f32.mrb[11].mxu0 }
 0x13e   : > { %v1280_v51 = vadd.f32 %v1276_v43, %v1262_v44  ;;  %v1265_v52 = vadd.f32 %v1264_v49, %v1216_v23 }
 0x13f   : > { %1286 = vst [vmem:[#allocation2 + $0x10] sm:$0xff] %v1282_v47  ;;  %v1283_v53 = vadd.f32 %v1279_v46, %v1273_v48 }
 0x140   : > { %1284 = vst [vmem:[#allocation2] sm:$0xff] %v1280_v51  ;;  %v1281_v54 = vadd.f32 %v1277_v50, %v1265_v52 }
 0x141   : > { %1287 = vst [vmem:[#allocation2 + $0x18] sm:$0xff] %v1283_v53 }
 0x142   : > { %1285 = vst [vmem:[#allocation2 + $0x8] sm:$0xff] %v1281_v54 }
 0x143 PF: > { %v3797_v59 = vld [vmem:[%s4163_s0 + $0x4] ss:$12 sps:$4 sm:$0xff]   ;;  %v3799_v60 = vld [vmem:[%s4163_s0] ss:$12 sps:$4 sm:$0xff]   ;;  %v3800_v61 = vld [vmem:[%s4163_s0 + $0x1c] ss:$12 sps:$4 sm:$0xff]   ;;  %s4896_s23 = scalar_lea.vmem %s4860_s7, %s4142_s20  ;;  %s4897_s1 = scalar_lea.vmem %s4861_s8, %s4142_s20 }
 0x144   : > { %v3802_v62 = vld [vmem:[%s4163_s0 + $0x8] ss:$12 sps:$4 sm:$0xff]   ;;  %1538 = vmatprep.subr.bf16.mxu0 %v3797_v59  ;;  %v3803_v15 = vld [vmem:[%s4163_s0 + $0x18] ss:$12 sps:$4 sm:$0xff]   ;;  %v3806_v17 = vld [vmem:[%s4163_s0 + $0x20] ss:$12 sps:$4 sm:$0xff]   ;;  %s4899_s22 = scalar_lea.vmem %s4865_s12, %s4142_s20  ;;  %s4901_s3 = scalar_lea.vmem %s4867_s14, %s4142_s20 }
 0x145   : > { %1539 = vmatpush1.bf16.msra.mxu0 %v3799_v60  ;;  %3592 = vmatprep.subr.bf16.mxu1 %v3802_v62  ;;  %v3804_v16 = vld [vmem:[%s4163_s0 + $0x34] ss:$12 sps:$4 sm:$0xff]   ;;  %v3807_v18 = vld [vmem:[%s4163_s0 + $0x30] ss:$12 sps:$4 sm:$0xff]   ;;  %v3808_v19 = vld [vmem:[%s4163_s0 + $0x4c] ss:$12 sps:$4 sm:$0xff]  }
 0x146   : > { %v1290_v56 = vld [vmem:[#allocation2 + $0x10] sm:$0xff]  ;;  %1540 = vmatprep.subr.bf16.mxu0 %v3800_v61  ;;  %3593 = vmatpush3.bf16.msra.mxu1 %v3802_v62  ;;  %v3810_v20 = vld [vmem:[%s4163_s0 + $0x38] ss:$12 sps:$4 sm:$0xff]   ;;  %v3815_v24 = vld [vmem:[%s4163_s0 + $0x60] ss:$12 sps:$4 sm:$0xff]   ;;  %v4023_v30 = vmov 0  }
 0x147   : > { %v1288_v55 = vld [vmem:[#allocation2] sm:$0xff]  ;;  %1298 = vadd.xlane.f32.xlu1 %v1290_v56  ;;  %3594 = vmatprep.subr.bf16.mxu1 %v3806_v17  ;;  %v3811_v21 = vld [vmem:[%s4163_s0 + $0x48] ss:$12 sps:$4 sm:$0xff]   ;;  %v3814_v23 = vld [vmem:[%s4163_s0 + $0x50] ss:$12 sps:$4 sm:$0xff]   ;;  %vm1654_vm0 = vcmask 261120  }
 0x148   : > { %1294 = vadd.xlane.f32.xlu0 %v1288_v55  ;;  %v1291_v58 = vld [vmem:[#allocation2 + $0x18] sm:$0xff]  ;;  %v3812_v22 = vld [vmem:[%s4163_s0 + $0x64] ss:$12 sps:$4 sm:$0xff]   ;;  %v3818_v26 = vld [vmem:[%s4163_s0 + $0x68] ss:$12 sps:$4 sm:$0xff]   ;;  %1570 = vmatprep.mubr.bf16.mxu0 %v4023_v30  ;;  %s4898_s19 = sld [smem:[#allocation10_spill]] }
 0x149   : > { %v1289_v57 = vld [vmem:[#allocation2 + $0x8] sm:$0xff]  ;;  %1541 = vmatpush1.bf16.msra.mxu0 %v3803_v15  ;;  %v3819_v27 = vld [vmem:[%s4163_s0 + $0x78] ss:$12 sps:$4 sm:$0xff]   ;;  %v3820_v28 = vld [vmem:[%s4163_s0 + $0x94] ss:$12 sps:$4 sm:$0xff]   ;;  %s4024_s27 = smov 96  }
 0x14a   : > { %1542 = vmatprep.subr.bf16.mxu0 %v3804_v16  ;;  %3595 = vmatpush3.bf16.msra.mxu1 %v3806_v17  ;;  %v3816_v25 = vld [vmem:[%s4163_s0 + $0x7c] ss:$12 sps:$4 sm:$0xff]   ;;  %v3822_v29 = vld [vmem:[%s4163_s0 + $0x80] ss:$12 sps:$4 sm:$0xff]   ;;  %v3826_v33 = vld [vmem:[%s4163_s0 + $0x98] ss:$12 sps:$4 sm:$0xff]  }
 0x14b   : > { %1300 = vadd.xlane.f32.xlu1 %v1291_v58  ;;  %3596 = vmatprep.subr.bf16.mxu1 %v3810_v20  ;;  %v3823_v31 = vld [vmem:[%s4163_s0 + $0x90] ss:$12 sps:$4 sm:$0xff]   ;;  %v3824_v32 = vld [vmem:[%s4163_s0 + $0xac] ss:$12 sps:$4 sm:$0xff]   ;;  %v3827_v34 = vld [vmem:[%s4163_s0 + $0xa8] ss:$12 sps:$4 sm:$0xff]  }
 0x14c   : > { %1296 = vadd.xlane.f32.xlu0 %v1289_v57  ;;  %v3828_v35 = vld [vmem:[%s4163_s0 + $0xb0] ss:$12 sps:$4 sm:$0xff]   ;;  %v3330_v50 = vld [vmem:[%s4896_s23] ss:$0 sm:$0xff]  ;;  %vm2403_vm1 = vcmask 523264   ;;  %vm2408_vm2 = vcmask 785408   ;;  %s4900_s0 = scalar_lea.vmem %s4866_s13, %s4142_s20 }
 0x14d   : > { %1543 = vmatpush1.bf16.msra.mxu0 %v3807_v18  ;;  %p3416_p5 = scmp.ne.s32.totalorder %s4136_s30, 2 }
 0x14e   : > { %1544 = vmatprep.subr.bf16.mxu0 %v3808_v19  ;;  %3597 = vmatpush3.bf16.msra.mxu1 %v3810_v20 }
 0x14f   : > { %3598 = vmatprep.subr.bf16.mxu1 %v3814_v23 }
 0x151   : > { %1545 = vmatpush1.bf16.msra.mxu0 %v3811_v21 }
 0x152   : > { %1546 = vmatprep.subr.bf16.mxu0 %v3812_v22  ;;  %3599 = vmatpush3.bf16.msra.mxu1 %v3814_v23 }
 0x153   : > { %3600 = vmatprep.subr.bf16.mxu1 %v3818_v26 }
 0x155   : > { %1547 = vmatpush1.bf16.msra.mxu0 %v3815_v24 }
 0x156   : > { %1548 = vmatprep.subr.bf16.mxu0 %v3816_v25  ;;  %3601 = vmatpush3.bf16.msra.mxu1 %v3818_v26 }
 0x157   : > { %3602 = vmatprep.subr.bf16.mxu1 %v3822_v29 }
 0x159   : > { %1549 = vmatpush1.bf16.msra.mxu0 %v3819_v27 }
 0x15a   : > { %1550 = vmatprep.subr.bf16.mxu0 %v3820_v28  ;;  %3603 = vmatpush3.bf16.msra.mxu1 %v3822_v29 }
 0x15b   : > { %3604 = vmatprep.subr.bf16.mxu1 %v3826_v33 }
 0x15d   : > { %1551 = vmatpush1.bf16.msra.mxu0 %v3823_v31 }
 0x15e   : > { %1552 = vmatprep.subr.bf16.mxu0 %v3824_v32  ;;  %3605 = vmatpush3.bf16.msra.mxu1 %v3826_v33 }
 0x15f   : > { %3606 = vmatprep.subr.bf16.mxu1 %v3828_v35 }
 0x161   : > { %1553 = vmatpush1.bf16.msra.mxu0 %v3827_v34 }
 0x162   : > { %3607 = vmatpush3.bf16.msra.mxu1 %v3828_v35 }
 0x1d4   : > { %v1299_v0 = vpop.xlane.xlu1 %1298 }
 0x1d5   : > { %v1295_v63 = vpop.xlane.xlu0 %1294  ;;  %v1305_v2 = vmul.f32 0.0078125, %v1299_v0 }
 0x1d6   : > { %v1303_v1 = vmul.f32 0.0078125, %v1295_v63 }
 0x1d7   : > { %v4405_v4 = vsub.f32 %v1290_v56, %v1305_v2 }
 0x1d8   : > { %v4403_v3 = vsub.f32 %v1288_v55, %v1303_v1  ;;  %v1301_v6 = vpop.xlane.xlu1 %1300  ;;  %v3331_v55 = vld [vmem:[%s4897_s1] ss:$0 sm:$0xff]  ;;  %s4025_s1 = smov 64  }
 0x1d9   : > { %v1297_v5 = vpop.xlane.xlu0 %1296  ;;  %v1306_v9 = vmul.f32 0.0078125, %v1301_v6  ;;  %v1313_v12 = vmul.f32 %v4405_v4, %v4405_v4 }
 0x1da   : > { %v1304_v7 = vmul.f32 0.0078125, %v1297_v5  ;;  %v1311_v8 = vmul.f32 %v4403_v3, %v4403_v3 }
 0x1db   : > { %v4411_v11 = vsub.f32 %v1291_v58, %v1306_v9 }
 0x1dc   : > { %v4409_v10 = vsub.f32 %v1289_v57, %v1304_v7  ;;  %1315 = vadd.xlane.f32.xlu0 %v1311_v8  ;;  %v1393_v7 = vld [vmem:[%s4172_s24] sm:$0x7]  ;;  %s4026_s24 = smov 32  }
 0x1dd   : > { %v1314_v14 = vmul.f32 %v4411_v11, %v4411_v11 }
 0x1de   : > { %v1312_v13 = vmul.f32 %v4409_v10, %v4409_v10 }
 0x1e0   : > { %1319 = vadd.xlane.f32.xlu0 %v1313_v12  ;;  %1317 = vadd.xlane.f32.xlu1 %v1312_v13 }
 0x1e4   : > { %1321 = vadd.xlane.f32.xlu1 %v1314_v14 }
 0x269   : > { %v1316_v36 = vpop.xlane.xlu0 %1315 }
 0x26a   : > { %v1323_v37 = vmul.f32 0.0078125, %v1316_v36 }
 0x26c   : > { %v1327_v38 = vadd.f32 1e-05, %v1323_v37 }
 0x26d   : > { %v1318_v39 = vpop.xlane.xlu1 %1317  ;;  %v1320_v40 = vpop.xlane.xlu0 %1319 }
 0x26e   : > { %3877 = vrsqrt.f32 %v1327_v38  ;;  %v1324_v41 = vmul.f32 0.0078125, %v1318_v39  ;;  %v1325_v42 = vmul.f32 0.0078125, %v1320_v40 }
 0x270   : > { %v1328_v43 = vadd.f32 1e-05, %v1324_v41  ;;  %v1329_v44 = vadd.f32 1e-05, %v1325_v42 }
 0x271   : > { %v1322_v45 = vpop.xlane.xlu1 %1321 }
 0x272   : > { %3879 = vrsqrt.f32 %v1328_v43  ;;  %v1326_v46 = vmul.f32 0.0078125, %v1322_v45 }
 0x273   : > { %3881 = vrsqrt.f32 %v1329_v44 }
 0x274   : > { %v1330_v47 = vadd.f32 1e-05, %v1326_v46 }
 0x276   : > { %3883 = vrsqrt.f32 %v1330_v47 }
 0x278   : > { %v3878_v48 = vpop.eup %3877 }
 0x279   : > { %v1335_v49 = vmul.f32 %v3878_v48, %v4403_v3 }
 0x27b   : > { %v1345_v54 = vmul.f32 %v3330_v50, %v1335_v49 }
 0x27c   : > { %v3880_v51 = vpop.eup %3879 }
 0x27d   : > { %v3882_v52 = vpop.eup %3881  ;;  %v1336_v53 = vmul.f32 %v3880_v51, %v4409_v10  ;;  %v1355_v59 = vadd.f32 %v3331_v55, %v1345_v54  ;;  %v4506_v54 = vld [vmem:[%s4898_s19 + $0x8] sm:$0xff] }
 0x27e   : > { %v1337_v56 = vmul.f32 %v3882_v52, %v4405_v4  ;;  %v1395_v4 = vlaneseq  ;;  %v4501_v52 = vld [vmem:[%s4898_s19 + $0x10] sm:$0xff] }
 0x27f   : > { %v1346_v57 = vmul.f32 %v3330_v50, %v1336_v53 }
 0x280   : > { %v3884_v58 = vpop.eup %3883  ;;  %v1347_v62 = vmul.f32 %v3330_v50, %v1337_v56  ;;  %v4455_v5 = vshrl.u32 %v1395_v4, 7 }
 0x281   : > { %v1356_v60 = vadd.f32 %v3331_v55, %v1346_v57  ;;  %v1338_v61 = vmul.f32 %v3884_v58, %v4411_v11  ;;  %v4512_v57 = vld [vmem:[%s4898_s19 + $0x18] sm:$0xff] }
 0x282   : > { %v1357_v1 = vadd.f32 %v3331_v55, %v1347_v62  ;;  %v1397_v6 = vsub.s32 0, %v4455_v5  ;;  %v1401_v8 = vsub.s32 1, %v4455_v5  ;;  %v1405_v10 = vsub.s32 2, %v4455_v5 }
 0x283   : > { %v1359_v63 = vpack.c.bf16 %v1356_v60, %v1355_v59  ;;  %v1348_v0 = vmul.f32 %v3330_v50, %v1338_v61  ;;  %v4496_v50 = vld [vmem:[%s4898_s19] sm:$0xff] }
 0x284   : > { %v1398_v9 = vrot.slane %v1393_v7, %v1397_v6  ;;  %v1402_v12 = vrot.slane %v1393_v7, %v1401_v8  ;;  %v1406_v18 = vrot.slane %v1393_v7, %v1405_v10 }
 0x285   : > { %1571 = vmatmul.mubr.bf16.vlgmr.msra.gmra.mrb[0].mxu0 %v1359_v63  ;;  %3608 = vmatprep.mubr.bf16.mxu1 %v1359_v63  ;;  %v1358_v2 = vadd.f32 %v3331_v55, %v1348_v0 }
 0x286   : > { %1580 = vmatprep.mubr.bf16.mxu0 %v4023_v30 }
 0x287   : > { %v1360_v3 = vpack.c.bf16 %v1358_v2, %v1357_v1 }
 0x289   : > { %3609 = vmatmul.mubr.bf16.vlgmr.msra.gmra.mrb[0].mxu1 %v1360_v3 }
 0x28d   : > { %1581 = vmatmul.mubr.bf16.gmra.mrb[4].mxu0 %v1360_v3 }
 0x358   : > { %v1572_v11 = vpop.f32.mrb[0].mxu0 }
 0x359   : > { %v1573_v13 = vadd.f32 %v1572_v11, %v1398_v9  ;;  %v1574_v14 = vpop.f32.mrb[1].mxu0 }
 0x35a   : > { %v1576_v15 = vpop.f32.mrb[2].mxu0  ;;  %v1575_v19 = vadd.f32 %v1574_v14, %v1402_v12 }
 0x35b   : > { %v1577_v16 = vadd.f32 %v1576_v15, %v1398_v9  ;;  %v1578_v17 = vpop.f32.mrb[3].mxu0  ;;  %v1644_v22 = vmul.f32 0.17677669, %v1573_v13 }
 0x35c   : > { %v1579_v20 = vadd.f32 %v1578_v17, %v1402_v12  ;;  %v3610_v21 = vpop.f32.mrb[0].mxu1 }
 0x35d   : > { %v1645_v23 = vmul.f32 0.17677669, %v1577_v16  ;;  %v1625_v24 = vpop.f32.mrb[1].mxu1  ;;  %v1634_v28 = vadd.f32 %v3610_v21, %v1406_v18 }
 0x35e   : > { %v4465_v25 = vpack.c.bf16 %v1579_v20, %v1575_v19  ;;  %v3611_v26 = vpop.f32.mrb[2].mxu1  ;;  %v1626_v32 = vadd.f32 %v1625_v24, %v1406_v18 }
 0x35f   : > { %v4467_v27 = vpack.c.bf16 %v1645_v23, %v1644_v22  ;;  %v1637_v29 = vadd.f32 %v3611_v26, %v1406_v18  ;;  %v1628_v31 = vpop.f32.mrb[3].mxu1 }
 0x360   : > { %v1629_v33 = vadd.f32 %v1628_v31, %v1406_v18  ;;  %v1582_v34 = vpop.f32.mrb[4].mxu0  ;;  %3696 = vmatprep.subr.msk.bf16.mxu0 %vm1654_vm0, %v4465_v25  ;;  %v1662_v35 = vsel %vm1654_vm0, %v4465_v25, 0 }
 0x361   : > { %v4473_v36 = vpack.c.bf16 %v1637_v29, %v1634_v28  ;;  %v1583_v37 = vadd.f32 %v1582_v34, %v1398_v9  ;;  %v1584_v38 = vpop.f32.mrb[5].mxu0  ;;  %3613 = vmatpush3.bf16.xpose.msra.mxu0 %v1662_v35  ;;  %3616 = vmatprep.mubr.msk.bf16.mxu0 %vm1654_vm0, %v4467_v27 }
 0x362   : > { %v4477_v39 = vpack.c.bf16 %v1629_v33, %v1626_v32  ;;  %v1586_v40 = vpop.f32.mrb[6].mxu0  ;;  %v1585_v43 = vadd.f32 %v1584_v38, %v1402_v12 }
 0x363   : > { %v1587_v41 = vadd.f32 %v1586_v40, %v1398_v9  ;;  %v1588_v42 = vpop.f32.mrb[7].mxu0  ;;  %v1646_v45 = vmul.f32 0.17677669, %v1583_v37 }
 0x364   : > { %v1589_v44 = vadd.f32 %v1588_v42, %v1402_v12  ;;  %3620 = vmatprep.subr.bf16.mxu1 %v4477_v39 }
 0x365   : > { %v1647_v46 = vmul.f32 0.17677669, %v1587_v41  ;;  %3621 = vmatpush3.bf16.msra.mxu1 %v4477_v39 }
 0x366   : > { %v4481_v47 = vpack.c.bf16 %v1589_v44, %v1585_v43  ;;  %3622 = vmatprep.subr.bf16.mxu1 %v4473_v36 }
 0x367   : > { %v4484_v48 = vpack.c.bf16 %v1647_v46, %v1646_v45 }
 0x368   : > { %3697 = vmatprep.subr.msk.bf16.mxu0 %vm1654_vm0, %v4481_v47  ;;  %v1665_v49 = vsel %vm1654_vm0, %v4481_v47, 0 }
 0x369   : > { %3615 = vmatpush3.bf16.xpose.msra.mxu0 %v1665_v49  ;;  %3623 = vmatpush3.bf16.msra.mxu1 %v4473_v36 }
 0x370   : > { %3617 = vmatmul.mubr.msk.bf16.vlgmr.msra.gmra.mrb[8].mxu0 %vm1654_vm0, %v4484_v48 }
 0x443   : > { %v3618_v51 = vpop.f32.mrb[8].mxu0 }
 0x444   : > { %v1701_v53 = vpop.f32.mrb[9].mxu0  ;;  %v1710_v59 = vadd.f32 %v3618_v51, %v4501_v52 }
 0x445   : > { %v1702_v55 = vadd.f32 %v1701_v53, %v4496_v50  ;;  %v3619_v56 = vpop.f32.mrb[10].mxu0 }
 0x446   : > { %v1704_v58 = vpop.f32.mrb[11].mxu0  ;;  %v1713_v62 = vadd.f32 %v3619_v56, %v4512_v57  ;;  %v1722_v0 = vsel %vm1654_vm0, %v1710_v59, -inf }
 0x447   : > { %v1705_v60 = vadd.f32 %v1704_v58, %v4506_v54  ;;  %v1716_v61 = vsel %vm1654_vm0, %v1702_v55, -inf }
 0x448   : > { %1717 = vmax.xlane.f32.xlu0 %v1716_v61  ;;  %v1725_v1 = vsel %vm1654_vm0, %v1713_v62, -inf }
 0x449   : > { %v1719_v63 = vsel %vm1654_vm0, %v1705_v60, -inf }
 0x44a   : > { %1720 = vmax.xlane.f32.xlu1 %v1719_v63 }
 0x44c   : > { %1723 = vmax.xlane.f32.xlu0 %v1722_v0 }
 0x44e   : > { %1726 = vmax.xlane.f32.xlu1 %v1725_v1 }
 0x4d5   : > { %v1718_v2 = vpop.xlane.xlu0 %1717 }
 0x4d6   : > { %v1728_v3 = vsub.f32 %v1702_v55, %v1718_v2 }
 0x4d7   : > { %v1721_v4 = vpop.xlane.xlu1 %1720 }
 0x4d8   : > { %v1729_v7 = vsub.f32 %v1705_v60, %v1721_v4  ;;  %v1732_v12 = vmul.f32 1.442695, %v1728_v3 }
 0x4d9   : > { %v1724_v9 = vpop.xlane.xlu0 %1723 }
 0x4da   : > { %v1734_v10 = vmul.f32 1.442695, %v1729_v7  ;;  %v1730_v11 = vsub.f32 %v1710_v59, %v1724_v9 }
 0x4db   : > { %v1727_v13 = vpop.xlane.xlu1 %1726 }
 0x4dc   : > { %3885 = vpow2.f32 %v1734_v10  ;;  %v1736_v14 = vmul.f32 1.442695, %v1730_v11  ;;  %v1731_v15 = vsub.f32 %v1713_v62, %v1727_v13 }
 0x4de   : > { %3887 = vpow2.f32 %v1736_v14  ;;  %v1738_v16 = vmul.f32 1.442695, %v1731_v15 }
 0x4df   : > { %3889 = vpow2.f32 %v1732_v12 }
 0x4e0   : > { %3891 = vpow2.f32 %v1738_v16 }
 0x4e6   : > { %v3886_v17 = vpop.eup %3885 }
 0x4e7   : > { %v1743_v18 = vsel %vm1654_vm0, %v3886_v17, 0.0 }
 0x4e8   : > { %v3888_v19 = vpop.eup %3887  ;;  %1744 = vadd.xlane.f32.xlu1 %v1743_v18 }
 0x4e9   : > { %v3890_v20 = vpop.eup %3889  ;;  %v1746_v21 = vsel %vm1654_vm0, %v3888_v19, 0.0 }
 0x4ea   : > { %v3892_v22 = vpop.eup %3891  ;;  %1747 = vadd.xlane.f32.xlu0 %v1746_v21  ;;  %v1740_v24 = vsel %vm1654_vm0, %v3890_v20, 0.0 }
 0x4eb   : > { %v1749_v23 = vsel %vm1654_vm0, %v3892_v22, 0.0 }
 0x4ec   : > { %1750 = vadd.xlane.f32.xlu1 %v1749_v23 }
 0x4ee   : > { %1741 = vadd.xlane.f32.xlu0 %v1740_v24 }
 0x4fd   : > { %1827 = vrot.lane.b32.xlu1 %v4481_v47, %s4024_s27 }
 0x501   : > { %1819 = vrot.lane.b32.xlu1 %v4467_v27, %s4024_s27 }
 0x504   : > { %1825 = vrot.lane.b32.xlu0 %v4465_v25, %s4024_s27 }
 0x505   : > { %2003 = vrot.lane.b32.xlu1 %v4465_v25, %s4025_s1 }
 0x508   : > { %1821 = vrot.lane.b32.xlu0 %v4484_v48, %s4024_s27 }
 0x509   : > { %2005 = vrot.lane.b32.xlu1 %v4481_v47, %s4025_s1 }
 0x50c   : > { %1999 = vrot.lane.b32.xlu0 %v4467_v27, %s4025_s1 }
 0x50d   : > { %2001 = vrot.lane.b32.xlu1 %v4484_v48, %s4025_s1 }
 0x575   : > { %v1745_v26 = vpop.xlane.xlu1 %1744 }
 0x576   : > { %3893 = vrcp.f32 %v1745_v26 }
 0x577   : > { %v1748_v28 = vpop.xlane.xlu0 %1747 }
 0x579   : > { %v1751_v29 = vpop.xlane.xlu1 %1750 }
 0x57a   : > { %3895 = vrcp.f32 %v1751_v29 }
 0x57b   : > { %3897 = vrcp.f32 %v1748_v28  ;;  %v1742_v31 = vpop.xlane.xlu0 %1741 }
 0x57c   : > { %3899 = vrcp.f32 %v1742_v31 }
 0x57d   : > { %v1828_v40 = vpop.permute.xlu1 %1827 }
 0x57e   : > { %v1839_v51 = vsel %vm1654_vm0, %v1828_v40, 0 }
 0x57f   : > { %v1826_v32 = vpop.permute.xlu0 %1825 }
 0x580   : > { %3698 = vmatprep.subr.msk.bf16.mxu1 %vm1654_vm0, %v1826_v32  ;;  %v3894_v33 = vpop.eup %3893  ;;  %v1836_v46 = vsel %vm1654_vm0, %v1826_v32, 0 }
 0x581   : > { %v1757_v42 = vmul.f32 %v3894_v33, %v3886_v17  ;;  %v1820_v49 = vpop.permute.xlu1 %1819 }
 0x583   : > { %v1822_v55 = vpop.permute.xlu0 %1821 }
 0x584   : > { %v3896_v34 = vpop.eup %3895 }
 0x585   : > { %v3898_v35 = vpop.eup %3897  ;;  %v1759_v38 = vmul.f32 %v3896_v34, %v3892_v22  ;;  %v2004_v53 = vpop.permute.xlu1 %2003 }
 0x586   : > { %v3900_v37 = vpop.eup %3899  ;;  %v1758_v43 = vmul.f32 %v3898_v35, %v3888_v19  ;;  %v2014_v56 = vsel %vm1654_vm0, %v2004_v53, 0 }
 0x587   : > { %v1756_v41 = vmul.f32 %v3900_v37, %v3890_v20  ;;  %v2000_v58 = vpop.permute.xlu0 %1999 }
 0x588   : > { %v1761_v45 = vpack.c.bf16 %v1759_v38, %v1758_v43 }
 0x589   : > { %v1760_v44 = vpack.c.bf16 %v1757_v42, %v1756_v41  ;;  %v2006_v59 = vpop.permute.xlu1 %2005 }
 0x58a   : > { %v2017_v60 = vsel %vm1654_vm0, %v2006_v59, 0 }
 0x58b   : > { %3624 = vmatprep.mubr.msk.bf16.mxu1 %vm1654_vm0, %v1760_v44 }
 0x58c   : > { %3625 = vmatmul.mubr.msk.bf16.vlgmr.msra.gmra.mrb[4].mxu1 %vm1654_vm0, %v1761_v45 }
 0x58d   : > { %3629 = vmatpush3.bf16.xpose.msra.mxu1 %v1836_v46  ;;  %3632 = vmatprep.mubr.msk.bf16.mxu1 %vm1654_vm0, %v1820_v49  ;;  %v2002_v61 = vpop.permute.xlu1 %2001 }
 0x58e   : > { %3699 = vmatprep.subr.msk.bf16.mxu1 %vm1654_vm0, %v1828_v40 }
 0x595   : > { %3631 = vmatpush3.bf16.xpose.msra.mxu1 %v1839_v51 }
 0x596   : > { %3700 = vmatprep.subr.msk.bf16.mxu1 %vm1654_vm0, %v2004_v53 }
 0x59c   : > { %3633 = vmatmul.mubr.msk.bf16.vlgmr.msra.gmra.mrb[8].mxu1 %vm1654_vm0, %v1822_v55 }
 0x59d   : > { %3645 = vmatpush3.bf16.xpose.msra.mxu1 %v2014_v56  ;;  %3648 = vmatprep.mubr.msk.bf16.mxu1 %vm1654_vm0, %v2000_v58 }
 0x59e   : > { %3701 = vmatprep.subr.msk.bf16.mxu1 %vm1654_vm0, %v2006_v59 }
 0x5a5   : > { %3647 = vmatpush3.bf16.xpose.msra.mxu1 %v2017_v60 }
 0x5ac   : > { %3649 = vmatmul.mubr.msk.bf16.vlgmr.msra.gmra.mrb[12].mxu1 %vm1654_vm0, %v2002_v61 }
 0x65f   : > { %v4555_v62 = vpop.f32.mrb[4].mxu1 }
 0x660   : > { %v4557_v63 = vpop.f32.mrb[5].mxu1 }
 0x661   : > { %v4559_v0 = vpop.f32.mrb[6].mxu1 }
 0x662   : > { %v4561_v1 = vpop.f32.mrb[7].mxu1 }
 0x66f   : > { %v3634_v2 = vpop.f32.mrb[8].mxu1 }
 0x670   : > { %v1875_v3 = vpop.f32.mrb[9].mxu1  ;;  %v4591_v49 = vadd.f32 %v3634_v2, %v4501_v52 }
 0x671   : > { %v3635_v4 = vpop.f32.mrb[10].mxu1  ;;  %v4588_v46 = vadd.f32 %v1875_v3, %v4496_v50 }
 0x672   : > { %v1878_v7 = vpop.f32.mrb[11].mxu1  ;;  %v4596_v51 = vadd.f32 %v3635_v4, %v4512_v57 }
 0x67f   : > { %v3650_v9 = vpop.f32.mrb[12].mxu1 }
 0x680   : > { %v2053_v10 = vpop.f32.mrb[13].mxu1  ;;  %v2062_v14 = vadd.f32 %v3650_v9, %v4501_v52 }
 0x681   : > { %v2054_v11 = vadd.f32 %v2053_v10, %v4496_v50  ;;  %v3651_v12 = vpop.f32.mrb[14].mxu1 }
 0x682   : > { %v2056_v13 = vpop.f32.mrb[15].mxu1  ;;  %v2065_v18 = vadd.f32 %v3651_v12, %v4512_v57  ;;  %v2074_v19 = vsel %vm1654_vm0, %v2062_v14, -inf }
 0x683   : > { %v2057_v15 = vadd.f32 %v2056_v13, %v4506_v54  ;;  %v2068_v16 = vsel %vm1654_vm0, %v2054_v11, -inf }
 0x684   : > { %2069 = vmax.xlane.f32.xlu0 %v2068_v16  ;;  %v2077_v20 = vsel %vm1654_vm0, %v2065_v18, -inf }
 0x685   : > { %v2071_v17 = vsel %vm1654_vm0, %v2057_v15, -inf }
 0x686   : > { %2072 = vmax.xlane.f32.xlu1 %v2071_v17 }
 0x688   : > { %2075 = vmax.xlane.f32.xlu0 %v2074_v19 }
 0x68c   : > { %2078 = vmax.xlane.f32.xlu0 %v2077_v20 }
 0x697   : > { %2116 = vrot.lane.b32.xlu1 %v4473_v36, %s4025_s1 }
 0x711   : > { %v2070_v21 = vpop.xlane.xlu0 %2069 }
 0x712   : > { %v2080_v22 = vsub.f32 %v2054_v11, %v2070_v21 }
 0x713   : > { %v2073_v23 = vpop.xlane.xlu1 %2072 }
 0x714   : > { %v2084_v28 = vmul.f32 1.442695, %v2080_v22  ;;  %v2081_v29 = vsub.f32 %v2057_v15, %v2073_v23 }
 0x715   : > { %v2076_v24 = vpop.xlane.xlu0 %2075 }
 0x716   : > { %v2082_v26 = vsub.f32 %v2062_v14, %v2076_v24  ;;  %v2086_v34 = vmul.f32 1.442695, %v2081_v29 }
 0x717   : > { %v2117_v55 = vpop.permute.xlu1 %2116 }
 0x718   : > { %v2088_v31 = vmul.f32 1.442695, %v2082_v26 }
 0x719   : > { %v2079_v32 = vpop.xlane.xlu0 %2078 }
 0x71a   : > { %3901 = vpow2.f32 %v2088_v31  ;;  %v2083_v33 = vsub.f32 %v2065_v18, %v2079_v32 }
 0x71b   : > { %3903 = vpow2.f32 %v2084_v28 }
 0x71c   : > { %v2090_v35 = vmul.f32 1.442695, %v2083_v33 }
 0x71e   : > { %3905 = vpow2.f32 %v2090_v35 }
 0x71f   : > { %3907 = vpow2.f32 %v2086_v34 }
 0x724   : > { %v3902_v37 = vpop.eup %3901 }
 0x725   : > { %v2098_v38 = vsel %vm1654_vm0, %v3902_v37, 0.0  ;;  %v3904_v40 = vpop.eup %3903 }
 0x726   : > { %2099 = vadd.xlane.f32.xlu0 %v2098_v38  ;;  %v2092_v42 = vsel %vm1654_vm0, %v3904_v40, 0.0 }
 0x728   : > { %v3906_v41 = vpop.eup %3905 }
 0x729   : > { %v2101_v43 = vsel %vm1654_vm0, %v3906_v41, 0.0  ;;  %v3908_v44 = vpop.eup %3907 }
 0x72a   : > { %2093 = vadd.xlane.f32.xlu0 %v2092_v42  ;;  %2102 = vadd.xlane.f32.xlu1 %v2101_v43  ;;  %v2095_v45 = vsel %vm1654_vm0, %v3908_v44, 0.0 }
 0x72e   : > { %2096 = vadd.xlane.f32.xlu1 %v2095_v45 }
 0x73f   : > { %2179 = vrot.lane.b32.xlu1 %v4465_v25, %s4026_s24  ;;  %v1890_v25 = vsel %vm1654_vm0, %v4588_v46, -inf }
 0x740   : > { %2114 = vrot.lane.b32.xlu0 %v4477_v39, %s4025_s1 }
 0x743   : > { %2181 = vrot.lane.b32.xlu1 %v4481_v47, %s4026_s24  ;;  %v1879_v47 = vadd.f32 %v1878_v7, %v4506_v54 }
 0x744   : > { %2175 = vrot.lane.b32.xlu0 %v4467_v27, %s4026_s24  ;;  %v1896_v27 = vsel %vm1654_vm0, %v4591_v49, -inf }
 0x745   : > { %v1893_v53 = vsel %vm1654_vm0, %v1879_v47, -inf }
 0x747   : > { %2177 = vrot.lane.b32.xlu1 %v4484_v48, %s4026_s24  ;;  %v1899_v48 = vsel %vm1654_vm0, %v4596_v51, -inf }
 0x763   : > { %1891 = vmax.xlane.f32.xlu0 %v1890_v25 }
 0x767   : > { %1897 = vmax.xlane.f32.xlu0 %v1896_v27 }
 0x76b   : > { %1900 = vmax.xlane.f32.xlu0 %v1899_v48  ;;  %1894 = vmax.xlane.f32.xlu1 %v1893_v53 }
 0x7b3   : > { %v2100_v56 = vpop.xlane.xlu0 %2099 }
 0x7b7   : > { %v2103_v58 = vpop.xlane.xlu1 %2102  ;;  %v2094_v59 = vpop.xlane.xlu0 %2093 }
 0x7b8   : > { %3909 = vrcp.f32 %v2103_v58 }
 0x7b9   : > { %3911 = vrcp.f32 %v2094_v59 }
 0x7ba   : > { %3913 = vrcp.f32 %v2100_v56 }
 0x7bb   : > { %v2097_v60 = vpop.xlane.xlu1 %2096  ;;  %v2115_v61 = vpop.permute.xlu0 %2114 }
 0x7bc   : > { %3915 = vrcp.f32 %v2097_v60  ;;  %3652 = vmatprep.subr.bf16.mxu1 %v2115_v61 }
 0x7bd   : > { %3653 = vmatpush3.bf16.msra.mxu1 %v2115_v61 }
 0x7be   : > { %3654 = vmatprep.subr.bf16.mxu1 %v2117_v55 }
 0x7bf   : > { %v2180_v2 = vpop.permute.xlu1 %2179  ;;  %v2176_v17 = vpop.permute.xlu0 %2175 }
 0x7c0   : > { %v2190_v16 = vsel %vm1654_vm0, %v2180_v2, 0 }
 0x7c1   : > { %3655 = vmatpush3.bf16.msra.mxu1 %v2117_v55 }
 0x7c2   : > { %3702 = vmatprep.subr.msk.bf16.mxu1 %vm1654_vm0, %v2180_v2  ;;  %v3910_v3 = vpop.eup %3909 }
 0x7c3   : > { %v3912_v4 = vpop.eup %3911  ;;  %v2111_v10 = vmul.f32 %v3910_v3, %v3906_v41  ;;  %v2182_v18 = vpop.permute.xlu1 %2181 }
 0x7c4   : > { %v3914_v7 = vpop.eup %3913  ;;  %v2108_v11 = vmul.f32 %v3912_v4, %v3904_v40  ;;  %v2193_v19 = vsel %vm1654_vm0, %v2182_v18, 0 }
 0x7c5   : > { %v2110_v13 = vmul.f32 %v3914_v7, %v3902_v37 }
 0x7c6   : > { %v3916_v9 = vpop.eup %3915 }
 0x7c7   : > { %v2109_v12 = vmul.f32 %v3916_v9, %v3908_v44  ;;  %v2113_v15 = vpack.c.bf16 %v2111_v10, %v2110_v13  ;;  %v2178_v20 = vpop.permute.xlu1 %2177 }
 0x7c9   : > { %v2112_v14 = vpack.c.bf16 %v2109_v12, %v2108_v11 }
 0x7cb   : > { %3656 = vmatprep.mubr.msk.bf16.mxu1 %vm1654_vm0, %v2112_v14 }
 0x7cc   : > { %3657 = vmatmul.mubr.msk.bf16.vlgmr.msra.gmra.mrb[16].mxu1 %vm1654_vm0, %v2113_v15 }
 0x7cd   : > { %3661 = vmatpush3.bf16.xpose.msra.mxu1 %v2190_v16  ;;  %3664 = vmatprep.mubr.msk.bf16.mxu1 %vm1654_vm0, %v2176_v17 }
 0x7ce   : > { %3703 = vmatprep.subr.msk.bf16.mxu1 %vm1654_vm0, %v2182_v18 }
 0x7d5   : > { %3663 = vmatpush3.bf16.xpose.msra.mxu1 %v2193_v19 }
 0x7dc   : > { %3665 = vmatmul.mubr.msk.bf16.vlgmr.msra.gmra.mrb[20].mxu1 %vm1654_vm0, %v2178_v20 }
 0x7dd   : > { %2747 = vmatprep.mubr.bf16.mxu1 %v4023_v30 }
 0x7f0   : > { %v1892_v21 = vpop.xlane.xlu0 %1891 }
 0x7f1   : > { %v1902_v33 = vsub.f32 %v4588_v46, %v1892_v21 }
 0x7f3   : > { %v1906_v37 = vmul.f32 1.442695, %v1902_v33 }
 0x7f4   : > { %v1898_v29 = vpop.xlane.xlu0 %1897 }
 0x7f5   : > { %v1904_v38 = vsub.f32 %v4591_v49, %v1898_v29  ;;  %3917 = vpow2.f32 %v1906_v37 }
 0x7f7   : > { %v1910_v42 = vmul.f32 1.442695, %v1904_v38 }
 0x7f8   : > { %v1895_v32 = vpop.xlane.xlu1 %1894  ;;  %v1901_v35 = vpop.xlane.xlu0 %1900 }
 0x7f9   : > { %v1903_v34 = vsub.f32 %v1879_v47, %v1895_v32  ;;  %v1905_v41 = vsub.f32 %v4596_v51, %v1901_v35 }
 0x7fb   : > { %v1908_v40 = vmul.f32 1.442695, %v1903_v34  ;;  %v1912_v44 = vmul.f32 1.442695, %v1905_v41 }
 0x7fd   : > { %3919 = vpow2.f32 %v1908_v40 }
 0x7fe   : > { %3921 = vpow2.f32 %v1910_v42 }
 0x7ff   : > { %3923 = vpow2.f32 %v1912_v44  ;;  %v3918_v56 = vpop.eup %3917 }
 0x807   : > { %v3920_v58 = vpop.eup %3919 }
 0x808   : > { %v1917_v59 = vsel %vm1654_vm0, %v3920_v58, 0.0 }
 0x89f   : > { %v4613_v22 = vpop.f32.mrb[16].mxu1 }
 0x8a0   : > { %v4615_v23 = vpop.f32.mrb[17].mxu1 }
 0x8a1   : > { %v4617_v24 = vpop.f32.mrb[18].mxu1 }
 0x8a2   : > { %v3782_v26 = vpack.i.bf16 %v4617_v24, %v4613_v22  ;;  %v4621_v28 = vpop.f32.mrb[19].mxu1 }
 0x8a3   : > { %v3777_v31 = vpack.i.bf16 %v4621_v28, %v4615_v23 }
 0x8af   : > { %v3666_v43 = vpop.f32.mrb[20].mxu1 }
 0x8b0   : > { %v2229_v45 = vpop.f32.mrb[21].mxu1  ;;  %v2238_v46 = vadd.f32 %v3666_v43, %v4501_v52  ;;  %v1914_v52 = vsel %vm1654_vm0, %v3918_v56, 0.0 }
 0x8b1   : > { %v2230_v25 = vadd.f32 %v2229_v45, %v4496_v50  ;;  %v3667_v27 = vpop.f32.mrb[22].mxu1 }
 0x8b2   : > { %v2232_v48 = vpop.f32.mrb[23].mxu1  ;;  %v2241_v51 = vadd.f32 %v3667_v27, %v4512_v57  ;;  %v2250_v55 = vsel %vm1654_vm0, %v2238_v46, -inf }
 0x8b3   : > { %v2233_v47 = vadd.f32 %v2232_v48, %v4506_v54  ;;  %v2244_v49 = vsel %vm1654_vm0, %v2230_v25, -inf  ;;  %v4637_v54 = vpop.eup %3921 }
 0x8b4   : > { %2245 = vmax.xlane.f32.xlu0 %v2244_v49  ;;  %v2253_v50 = vsel %vm1654_vm0, %v2241_v51, -inf  ;;  %v4640_v60 = vpop.eup %3923  ;;  %v1920_v57 = vsel %vm1654_vm0, %v4637_v54, 0.0 }
 0x8b5   : > { %v2247_v53 = vsel %vm1654_vm0, %v2233_v47, -inf  ;;  %v1923_v61 = vsel %vm1654_vm0, %v4640_v60, 0.0 }
 0x8b6   : > { %2248 = vmax.xlane.f32.xlu1 %v2247_v53 }
 0x8b8   : > { %2251 = vmax.xlane.f32.xlu0 %v2250_v55 }
 0x8ba   : > { %2254 = vmax.xlane.f32.xlu1 %v2253_v50 }
 0x8bc   : > { %1915 = vadd.xlane.f32.xlu0 %v1914_v52 }
 0x8be   : > { %1918 = vadd.xlane.f32.xlu1 %v1917_v59 }
 0x8c0   : > { %1921 = vadd.xlane.f32.xlu0 %v1920_v57 }
 0x8c2   : > { %1924 = vadd.xlane.f32.xlu1 %v1923_v61 }
 0x8d3   : > { %1940 = vrot.lane.b32.xlu1 %v4473_v36, %s4024_s27 }
 0x8d7   : > { %2290 = vrot.lane.b32.xlu1 %v4477_v39, %s4026_s24 }
 0x941   : > { %v2246_v2 = vpop.xlane.xlu0 %2245 }
 0x942   : > { %v2256_v3 = vsub.f32 %v2230_v25, %v2246_v2 }
 0x943   : > { %v2249_v4 = vpop.xlane.xlu1 %2248 }
 0x944   : > { %v2260_v7 = vmul.f32 1.442695, %v2256_v3  ;;  %v2257_v10 = vsub.f32 %v2233_v47, %v2249_v4  ;;  %v3829_v4 = vld [vmem:[%s4158_s29] sm:$0xff]  }
 0x945   : > { %v2252_v9 = vpop.xlane.xlu0 %2251 }
 0x946   : > { %v2258_v11 = vsub.f32 %v2238_v46, %v2252_v9  ;;  %3925 = vpow2.f32 %v2260_v7  ;;  %v2262_v16 = vmul.f32 1.442695, %v2257_v10  ;;  %v3830_v7 = vld [vmem:[%s4158_s29 + $0x8] sm:$0xff]   ;;  %v3831_v9 = vld [vmem:[%s4158_s29 + $0x10] sm:$0xff]   ;;  %v3832_v10 = vld [vmem:[%s4158_s29 + $0x18] sm:$0xff]  }
 0x947   : > { %v2255_v12 = vpop.xlane.xlu1 %2254 }
 0x948   : > { %v2264_v13 = vmul.f32 1.442695, %v2258_v11  ;;  %v2259_v14 = vsub.f32 %v2241_v51, %v2255_v12  ;;  %v3833_v11 = vld [vmem:[%s4158_s29 + $0x20] sm:$0xff]   ;;  %v3834_v12 = vld [vmem:[%s4158_s29 + $0x28] sm:$0xff]  }
 0x949   : > { %v1916_v15 = vpop.xlane.xlu0 %1915 }
 0x94a   : > { %3927 = vpow2.f32 %v2264_v13  ;;  %v2266_v17 = vmul.f32 1.442695, %v2259_v14  ;;  %v3835_v13 = vld [vmem:[%s4158_s29 + $0x30] sm:$0xff]  }
 0x94b   : > { %3929 = vrcp.f32 %v1916_v15  ;;  %v1919_v18 = vpop.xlane.xlu1 %1918 }
 0x94c   : > { %3931 = vpow2.f32 %v2266_v17  ;;  %v3836_v17 = vld [vmem:[%s4158_s29 + $0x38] sm:$0xff]   ;;  %s4903_s29 = sld [smem:[#allocation12_spill]] (!%p3416_p5) }
 0x94d   : > { %3933 = vrcp.f32 %v1919_v18  ;;  %v1922_v45 = vpop.xlane.xlu0 %1921 }
 0x94e   : > { %3935 = vpow2.f32 %v2262_v16 }
 0x94f   : > { %v1925_v43 = vpop.xlane.xlu1 %1924 }
 0x950   : > { %v3926_v19 = vpop.eup %3925  ;;  %3937 = vrcp.f32 %v1925_v43 }
 0x951   : > { %v2268_v40 = vsel %vm1654_vm0, %v3926_v19, 0.0  ;;  %3939 = vrcp.f32 %v1922_v45 }
 0x953   : > { %v1941_v44 = vpop.permute.xlu1 %1940 }
 0x954   : > { %v3928_v20 = vpop.eup %3927 }
 0x955   : > { %v3930_v21 = vpop.eup %3929  ;;  %v2274_v29 = vsel %vm1654_vm0, %v3928_v20, 0.0 }
 0x956   : > { %v3932_v32 = vpop.eup %3931  ;;  %2275 = vadd.xlane.f32.xlu0 %v2274_v29  ;;  %v1930_v37 = vmul.f32 %v3930_v21, %v3918_v56 }
 0x957   : > { %v3934_v33 = vpop.eup %3933  ;;  %v2277_v34 = vsel %vm1654_vm0, %v3932_v32, 0.0  ;;  %v2291_v25 = vpop.permute.xlu1 %2290 }
 0x958   : > { %v3936_v35 = vpop.eup %3935  ;;  %2278 = vadd.xlane.f32.xlu1 %v2277_v34  ;;  %v1931_v38 = vmul.f32 %v3934_v33, %v3920_v58 }
 0x959   : > { %v2271_v42 = vsel %vm1654_vm0, %v3936_v35, 0.0 }
 0x95a   : > { %2269 = vadd.xlane.f32.xlu0 %v2268_v40  ;;  %v1934_v41 = vpack.c.bf16 %v1931_v38, %v1930_v37  ;;  %v3938_v49 = vpop.eup %3937 }
 0x95c   : > { %3640 = vmatprep.mubr.msk.bf16.mxu0 %vm1654_vm0, %v1934_v41  ;;  %2272 = vadd.xlane.f32.xlu1 %v2271_v42 }
 0x96d   : > { %2292 = vrot.lane.b32.xlu1 %v4473_v36, %s4026_s24  ;;  %v3940_v36 = vpop.eup %3939 }
 0x96e   : > { %v1932_v53 = vmul.f32 %v3940_v36, %v4637_v54 }
 0x970   : > { %1938 = vrot.lane.b32.xlu0 %v4477_v39, %s4024_s27  ;;  %v1933_v39 = vmul.f32 %v3938_v49, %v4640_v60 }
 0x972   : > { %v1935_v56 = vpack.c.bf16 %v1933_v39, %v1932_v53 }
 0x9e3   : > { %v2276_v27 = vpop.xlane.xlu0 %2275 }
 0x9e5   : > { %v2279_v48 = vpop.xlane.xlu1 %2278 }
 0x9e7   : > { %v2270_v46 = vpop.xlane.xlu0 %2269 }
 0x9e8   : > { %3941 = vrcp.f32 %v2270_v46 }
 0x9e9   : > { %3943 = vrcp.f32 %v2279_v48  ;;  %v2273_v47 = vpop.xlane.xlu1 %2272 }
 0x9ea   : > { %3945 = vrcp.f32 %v2273_v47 }
 0x9eb   : > { %3947 = vrcp.f32 %v2276_v27  ;;  %v1939_v51 = vpop.permute.xlu0 %1938 }
 0x9ec   : > { %3636 = vmatprep.subr.bf16.mxu0 %v1939_v51 }
 0x9ed   : > { %3637 = vmatpush3.bf16.msra.mxu0 %v1939_v51  ;;  %v2293_v59 = vpop.permute.xlu1 %2292 }
 0x9ee   : > { %3638 = vmatprep.subr.bf16.mxu0 %v1941_v44 }
 0x9f1   : > { %3639 = vmatpush3.bf16.msra.mxu0 %v1941_v44 }
 0x9f2   : > { %v3942_v55 = vpop.eup %3941  ;;  %3668 = vmatprep.subr.bf16.mxu0 %v2291_v25 }
 0x9f3   : > { %v3944_v50 = vpop.eup %3943  ;;  %v2284_v57 = vmul.f32 %v3942_v55, %v3926_v19 }
 0x9f4   : > { %v3946_v58 = vpop.eup %3945  ;;  %3641 = vmatmul.mubr.msk.bf16.vlgmr.msra.gmra.mrb[12].mxu0 %vm1654_vm0, %v1935_v56  ;;  %v2287_v60 = vmul.f32 %v3944_v50, %v3932_v32 }
 0x9f5   : > { %v3948_v52 = vpop.eup %3947  ;;  %3669 = vmatpush3.bf16.msra.mxu0 %v2291_v25  ;;  %v2285_v61 = vmul.f32 %v3946_v58, %v3936_v35 }
 0x9f6   : > { %3670 = vmatprep.subr.bf16.mxu0 %v2293_v59  ;;  %v2286_v2 = vmul.f32 %v3948_v52, %v3928_v20  ;;  %v3372_v52 = vld [vmem:[%s4899_s22] ss:$0 sm:$0xff] }
 0x9f7   : > { %v2288_v54 = vpack.c.bf16 %v2285_v61, %v2284_v57 }
 0x9f8   : > { %v2289_v3 = vpack.c.bf16 %v2287_v60, %v2286_v2 }
 0x9f9   : > { %3671 = vmatpush3.bf16.msra.mxu0 %v2293_v59  ;;  %3672 = vmatprep.mubr.msk.bf16.mxu0 %vm1654_vm0, %v2288_v54 }
 0x9fa   : > { %3676 = vmatprep.subr.bf16.mxu0 %v3829_v4 }
 0x9fc   : > { %3673 = vmatmul.mubr.msk.bf16.vlgmr.msra.gmra.mrb[16].mxu0 %vm1654_vm0, %v2289_v3  ;;  %v3973_v3 = vld [vmem:[#allocation2] sm:$0xff] }
 0x9fd   : > { %3677 = vmatpush3.bf16.msra.mxu0 %v3829_v4 }
 0x9fe   : > { %3678 = vmatprep.subr.bf16.mxu0 %v3830_v7 }
 0xa01   : > { %3679 = vmatpush3.bf16.msra.mxu0 %v3830_v7 }
 0xa02   : > { %3680 = vmatprep.subr.bf16.mxu0 %v3831_v9 }
 0xa05   : > { %3681 = vmatpush3.bf16.msra.mxu0 %v3831_v9  ;;  %v3974_v9 = vld [vmem:[#allocation2 + $0x8] sm:$0xff] }
 0xa06   : > { %3682 = vmatprep.subr.bf16.mxu0 %v3832_v10 }
 0xa09   : > { %3683 = vmatpush3.bf16.msra.mxu0 %v3832_v10 }
 0xa0a   : > { %3684 = vmatprep.subr.bf16.mxu0 %v3833_v11 }
 0xa0d   : > { %3685 = vmatpush3.bf16.msra.mxu0 %v3833_v11  ;;  %v3975_v11 = vld [vmem:[#allocation2 + $0x10] sm:$0xff] }
 0xa0e   : > { %3686 = vmatprep.subr.bf16.mxu0 %v3834_v12 }
 0xa11   : > { %3687 = vmatpush3.bf16.msra.mxu0 %v3834_v12 }
 0xa12   : > { %3688 = vmatprep.subr.bf16.mxu0 %v3835_v13 }
 0xa15   : > { %3689 = vmatpush3.bf16.msra.mxu0 %v3835_v13 }
 0xa16   : > { %3690 = vmatprep.subr.bf16.mxu0 %v3836_v17 }
 0xa19   : > { %3691 = vmatpush3.bf16.msra.mxu0 %v3836_v17  ;;  %v3839_v17 = vld [vmem:[%s4186_s9 + $0x4] ss:$8 sps:$4 sm:$0xff]  }
 0xa1a   : > { %2715 = vmatprep.subr.bf16.mxu1 %v3839_v17 }
 0xac7   : > { %v3642_v14 = vpop.f32.mrb[12].mxu0 }
 0xac8   : > { %v1984_v15 = vpop.f32.mrb[13].mxu0 }
 0xac9   : > { %v3643_v16 = vpop.f32.mrb[14].mxu0 }
 0xaca   : > { %v3772_v18 = vpack.i.bf16 %v3643_v16, %v3642_v14  ;;  %v1987_v19 = vpop.f32.mrb[15].mxu0  ;;  %v3976_v14 = vld [vmem:[#allocation2 + $0x18] sm:$0xff]  ;;  %v3837_v16 = vld [vmem:[%s4186_s9] ss:$8 sps:$4 sm:$0xff]  }
 0xacb   : > { %v3767_v20 = vpack.i.bf16 %v1987_v19, %v1984_v15  ;;  %2716 = vmatpush1.bf16.msra.mxu1 %v3837_v16  ;;  %v3840_v19 = vld [vmem:[%s4186_s9 + $0x10] ss:$8 sps:$4 sm:$0xff]  }
 0xacc   : > { %3773 = vrot.lane.b32.xlu1 %v3772_v18, %s4026_s24  ;;  %v3842_v18 = vld [vmem:[%s4186_s9 + $0x14] ss:$8 sps:$4 sm:$0xff]  }
 0xacd   : > { %3768 = vrot.lane.b32.xlu0 %v3767_v20, %s4026_s24  ;;  %2717 = vmatprep.subr.bf16.mxu1 %v3842_v18 }
 0xacf   : > { %v3674_v21 = vpop.f32.mrb[16].mxu0  ;;  %2718 = vmatpush1.bf16.msra.mxu1 %v3840_v19 }
 0xad0   : > { %3783 = vrot.lane.b32.xlu1 %v3782_v26, %s4025_s1  ;;  %v2336_v29 = vpop.f32.mrb[17].mxu0 }
 0xad1   : > { %3778 = vrot.lane.b32.xlu0 %v3777_v31, %s4025_s1  ;;  %v3675_v32 = vpop.f32.mrb[18].mxu0 }
 0xad2   : > { %v3792_v33 = vpack.i.bf16 %v3675_v32, %v3674_v21  ;;  %v2339_v34 = vpop.f32.mrb[19].mxu0 }
 0xad3   : > { %v3787_v35 = vpack.i.bf16 %v2339_v34, %v2336_v29 }
 0xad4   : > { %3793 = vrot.lane.b32.xlu1 %v3792_v33, %s4024_s27 }
 0xad5   : > { %3788 = vrot.lane.b32.xlu0 %v3787_v35, %s4024_s27  ;;  %s4902_s27 = sld [smem:[#allocation11_spill]] (!%p3416_p5) }
 0xb3e   : > { %v3774_v37 = vpop.permute.xlu1 %3773 }
 0xb3f   : > { %v3769_v38 = vpop.permute.xlu0 %3768  ;;  %v3776_v40 = vunpack.i.h.bf16 %v3774_v37  ;;  %v3775_v41 = vunpack.i.l.bf16 %v3774_v37 }
 0xb40   : > { %v3771_v24 = vunpack.i.h.bf16 %v3769_v38  ;;  %v3770_v26 = vunpack.i.l.bf16 %v3769_v38 }
 0xb41   : > { %v2402_v31 = vsel %vm1654_vm0, %v4559_v0, %v3776_v40  ;;  %v2401_v45 = vsel %vm1654_vm0, %v4555_v62, %v3775_v41 }
 0xb42   : > { %v3784_v22 = vpop.permute.xlu1 %3783  ;;  %v2400_v27 = vsel %vm1654_vm0, %v4561_v1, %v3771_v24  ;;  %v2399_v48 = vsel %vm1654_vm0, %v4557_v63, %v3770_v26 }
 0xb43   : > { %v3779_v42 = vpop.permute.xlu0 %3778  ;;  %v3786_v43 = vunpack.i.h.bf16 %v3784_v22  ;;  %v3785_v44 = vunpack.i.l.bf16 %v3784_v22 }
 0xb44   : > { %v3781_v23 = vunpack.i.h.bf16 %v3779_v42  ;;  %v3780_v28 = vunpack.i.l.bf16 %v3779_v42 }
 0xb45   : > { %v2406_v51 = vsel %vm2403_vm1, %v2401_v45, %v3785_v44  ;;  %v2407_v36 = vsel %vm2403_vm1, %v2402_v31, %v3786_v43  ;;  %v3845_v44 = vld [vmem:[%s4186_s9 + $0x24] ss:$8 sps:$4 sm:$0xff]   ;;  %v3846_v31 = vld [vmem:[%s4186_s9 + $0x30] ss:$8 sps:$4 sm:$0xff]  }
 0xb46   : > { %v3794_v25 = vpop.permute.xlu1 %3793  ;;  %v2404_v62 = vsel %vm2403_vm1, %v2399_v48, %v3780_v28  ;;  %v2405_v53 = vsel %vm2403_vm1, %v2400_v27, %v3781_v23  ;;  %v3843_v23 = vld [vmem:[%s4186_s9 + $0x20] ss:$8 sps:$4 sm:$0xff]   ;;  %2719 = vmatprep.subr.bf16.mxu1 %v3845_v44  ;;  %v3848_v28 = vld [vmem:[%s4186_s9 + $0x34] ss:$8 sps:$4 sm:$0xff]   ;;  %v3851_v45 = vld [vmem:[%s4186_s9 + $0x44] ss:$8 sps:$4 sm:$0xff]  }
 0xb47   : > { %v3796_v46 = vunpack.i.h.bf16 %v3794_v25  ;;  %v3795_v47 = vunpack.i.l.bf16 %v3794_v25  ;;  %v3789_v49 = vpop.permute.xlu0 %3788  ;;  %2720 = vmatpush1.bf16.msra.mxu1 %v3843_v23  ;;  %v3849_v25 = vld [vmem:[%s4186_s9 + $0x40] ss:$8 sps:$4 sm:$0xff]   ;;  %v3854_v27 = vld [vmem:[%s4186_s9 + $0x54] ss:$8 sps:$4 sm:$0xff]   ;;  %v3852_v48 = vld [vmem:[%s4186_s9 + $0x50] ss:$8 sps:$4 sm:$0xff]  }
 0xb48   : > { %v3791_v0 = vunpack.i.h.bf16 %v3789_v49  ;;  %v3790_v39 = vunpack.i.l.bf16 %v3789_v49  ;;  %2721 = vmatprep.subr.bf16.mxu1 %v3848_v28  ;;  %v3860_v49 = vld [vmem:[%s4186_s9 + $0x74] ss:$8 sps:$4 sm:$0xff]  }
 0xb49   : > { %v2412_v55 = vsel %vm2408_vm2, %v2407_v36, %v3796_v46  ;;  %v2411_v1 = vsel %vm2408_vm2, %v2406_v51, %v3795_v47  ;;  %v3857_v46 = vld [vmem:[%s4186_s9 + $0x64] ss:$8 sps:$4 sm:$0xff]   ;;  %v3855_v47 = vld [vmem:[%s4186_s9 + $0x60] ss:$8 sps:$4 sm:$0xff]   ;;  %v3858_v51 = vld [vmem:[%s4186_s9 + $0x70] ss:$8 sps:$4 sm:$0xff]  }
 0xb4a   : > { %v2414_v56 = vpack.c.bf16 %v2412_v55, %v2411_v1  ;;  %v2409_v63 = vsel %vm2408_vm2, %v2404_v62, %v3790_v39  ;;  %v2410_v50 = vsel %vm2408_vm2, %v2405_v53, %v3791_v0  ;;  %v3874_v44 = vld [vmem:[%s4197_s4 + $0x30] sm:$0xff]   ;;  %v3875_v23 = vld [vmem:[%s4197_s4 + $0x78] sm:$0xff]  }
 0xb4b   : > { %v2413_v58 = vpack.c.bf16 %v2410_v50, %v2409_v63  ;;  %2722 = vmatpush1.bf16.msra.mxu1 %v3846_v31  ;;  %v3876_v28 = vld [vmem:[%s4197_s4 + $0x38] sm:$0xff]   ;;  %v2623_v31 = vld [vmem:[%s4192_s26] sm:$0x3] }
 0xb4c   : > { %2723 = vmatprep.subr.bf16.mxu1 %v3851_v45  ;;  %v2628_v45 = vrot.slane %v2623_v31, %v1397_v6 }
 0xb4d   : > { %3692 = vmatprep.mubr.bf16.mxu0 %v2413_v58 }
 0xb4e   : > { %3693 = vmatmul.mubr.bf16.vlgmr.msra.gmra.mrb[20].mxu0 %v2414_v56 }
 0xb4f   : > { %2724 = vmatpush1.bf16.msra.mxu1 %v3849_v25  ;;  %v2632_v25 = vrot.slane %v2623_v31, %v1401_v8 }
 0xb50   : > { %2725 = vmatprep.subr.bf16.mxu1 %v3854_v27 }
 0xb53   : > { %2726 = vmatpush1.bf16.msra.mxu1 %v3852_v48 }
 0xb54   : > { %2727 = vmatprep.subr.bf16.mxu1 %v3857_v46 }
 0xb57   : > { %2728 = vmatpush1.bf16.msra.mxu1 %v3855_v47 }
 0xb58   : > { %2729 = vmatprep.subr.bf16.mxu1 %v3860_v49 }
 0xb5b   : > { %2730 = vmatpush1.bf16.msra.mxu1 %v3858_v51 }
 0xc21   : > { %v3694_v59 = vpop.f32.mrb[20].mxu0 }
 0xc22   : > { %v2520_v57 = vpop.f32.mrb[21].mxu0  ;;  %v2529_v2 = vadd.f32 %v3694_v59, %v3372_v52 }
 0xc23   : > { %v2521_v61 = vadd.f32 %v3372_v52, %v2520_v57  ;;  %v3695_v60 = vpop.f32.mrb[22].mxu0  ;;  %v3381_v57 = vld [vmem:[%s4900_s0] ss:$0 sm:$0xff] }
 0xc24   : > { %v2523_v54 = vpop.f32.mrb[23].mxu0  ;;  %v4710_v12 = vadd.f32 %v3975_v11, %v2529_v2  ;;  %v2532_v13 = vadd.f32 %v3695_v60, %v3372_v52 }
 0xc25   : > { %v4705_v4 = vadd.f32 %v3973_v3, %v2521_v61  ;;  %v2524_v7 = vadd.f32 %v3372_v52, %v2523_v54 }
 0xc26   : > { %v4714_v15 = vadd.f32 %v3976_v14, %v2532_v13 }
 0xc27   : > { %v4707_v10 = vadd.f32 %v3974_v9, %v2524_v7  ;;  %2541 = vadd.xlane.f32.xlu0 %v4705_v4  ;;  %v3382_v7 = vld [vmem:[%s4901_s3] ss:$0 sm:$0xff] }
 0xc29   : > { %2543 = vadd.xlane.f32.xlu1 %v4707_v10 }
 0xc2b   : > { %2545 = vadd.xlane.f32.xlu0 %v4710_v12 }
 0xc2f   : > { %2547 = vadd.xlane.f32.xlu0 %v4714_v15 }
 0xcb4   : > { %v2542_v20 = vpop.xlane.xlu0 %2541 }
 0xcb5   : > { %v2549_v21 = vmul.f32 0.0078125, %v2542_v20 }
 0xcb6   : > { %v2544_v29 = vpop.xlane.xlu1 %2543 }
 0xcb7   : > { %v2553_v32 = vsub.f32 %v4705_v4, %v2549_v21  ;;  %v2550_v33 = vmul.f32 0.0078125, %v2544_v29 }
 0xcb8   : > { %v2546_v34 = vpop.xlane.xlu0 %2545 }
 0xcb9   : > { %v2554_v35 = vsub.f32 %v4707_v10, %v2550_v33  ;;  %v2551_v37 = vmul.f32 0.0078125, %v2546_v34  ;;  %v2557_v38 = vmul.f32 %v2553_v32, %v2553_v32  ;;  %v3861_v33 = vld [vmem:[%s4197_s4 + $0x40] sm:$0xff]  }
 0xcba   : > { %v3862_v34 = vld [vmem:[%s4197_s4] sm:$0xff]   ;;  %3544 = vmatprep.subr.bf16.mxu0 %v3861_v33 }
 0xcbb   : > { %v2555_v40 = vsub.f32 %v4710_v12, %v2551_v37  ;;  %2561 = vadd.xlane.f32.xlu0 %v2557_v38  ;;  %v2558_v41 = vmul.f32 %v2554_v35, %v2554_v35  ;;  %3545 = vmatpush3.bf16.msra.mxu0 %v3862_v34  ;;  %v3864_v37 = vld [vmem:[%s4197_s4 + $0x8] sm:$0xff]   ;;  %v3866_v38 = vld [vmem:[%s4197_s4 + $0x10] sm:$0xff]  }
 0xcbc   : > { %v2548_v22 = vpop.xlane.xlu0 %2547 }
 0xcbd   : > { %v2552_v24 = vmul.f32 0.0078125, %v2548_v22  ;;  %2563 = vadd.xlane.f32.xlu1 %v2558_v41  ;;  %v2559_v26 = vmul.f32 %v2555_v40, %v2555_v40  ;;  %v3868_v41 = vld [vmem:[%s4197_s4 + $0x18] sm:$0xff]   ;;  %v3869_v22 = vld [vmem:[%s4197_s4 + $0x60] sm:$0xff]  }
 0xcbf   : > { %v2556_v42 = vsub.f32 %v4714_v15, %v2552_v24  ;;  %2565 = vadd.xlane.f32.xlu0 %v2559_v26  ;;  %v3870_v24 = vld [vmem:[%s4197_s4 + $0x20] sm:$0xff]   ;;  %v3871_v26 = vld [vmem:[%s4197_s4 + $0x68] sm:$0xff]  }
 0xcc1   : > { %v2560_v43 = vmul.f32 %v2556_v42, %v2556_v42 }
 0xcc3   : > { %2567 = vadd.xlane.f32.xlu1 %v2560_v43  ;;  %v3873_v43 = vld [vmem:[%s4197_s4 + $0x70] sm:$0xff]  }
 0xd48   : > { %v2562_v36 = vpop.xlane.xlu0 %2561 }
 0xd49   : > { %v2569_v0 = vmul.f32 0.0078125, %v2562_v36 }
 0xd4a   : > { %v2564_v39 = vpop.xlane.xlu1 %2563 }
 0xd4b   : > { %v2573_v62 = vadd.f32 1e-05, %v2569_v0  ;;  %v2570_v53 = vmul.f32 0.0078125, %v2564_v39 }
 0xd4c   : > { %v2566_v55 = vpop.xlane.xlu0 %2565 }
 0xd4d   : > { %3949 = vrsqrt.f32 %v2573_v62  ;;  %v2574_v1 = vadd.f32 1e-05, %v2570_v53  ;;  %v2571_v56 = vmul.f32 0.0078125, %v2566_v55 }
 0xd4f   : > { %3951 = vrsqrt.f32 %v2574_v1  ;;  %v2575_v63 = vadd.f32 1e-05, %v2571_v56 }
 0xd50   : > { %v2568_v50 = vpop.xlane.xlu1 %2567 }
 0xd51   : > { %3953 = vrsqrt.f32 %v2575_v63  ;;  %v2572_v58 = vmul.f32 0.0078125, %v2568_v50 }
 0xd53   : > { %v2576_v52 = vadd.f32 1e-05, %v2572_v58 }
 0xd55   : > { %3955 = vrsqrt.f32 %v2576_v52 }
 0xd57   : > { %v3950_v59 = vpop.eup %3949 }
 0xd58   : > { %v2581_v61 = vmul.f32 %v3950_v59, %v2553_v32 }
 0xd59   : > { %v3952_v60 = vpop.eup %3951 }
 0xd5a   : > { %v2582_v54 = vmul.f32 %v3952_v60, %v2554_v35  ;;  %v2591_v2 = vmul.f32 %v3381_v57, %v2581_v61  ;;  %v3863_v35 = vld [vmem:[%s4197_s4 + $0x48] sm:$0xff]  }
 0xd5b   : > { %v3954_v3 = vpop.eup %3953  ;;  %3546 = vmatprep.subr.bf16.mxu0 %v3863_v35 }
 0xd5c   : > { %v2592_v9 = vmul.f32 %v3381_v57, %v2582_v54  ;;  %v2601_v11 = vadd.f32 %v3382_v7, %v2591_v2  ;;  %v2583_v14 = vmul.f32 %v3954_v3, %v2555_v40  ;;  %3547 = vmatpush3.bf16.msra.mxu0 %v3864_v37  ;;  %v3867_v40 = vld [vmem:[%s4197_s4 + $0x58] sm:$0xff]  }
 0xd5e   : > { %v2602_v13 = vadd.f32 %v3382_v7, %v2592_v9  ;;  %v2593_v19 = vmul.f32 %v3381_v57, %v2583_v14 }
 0xd5f   : > { %v3956_v16 = vpop.eup %3955 }
 0xd60   : > { %v2605_v17 = vpack.c.bf16 %v2602_v13, %v2601_v11  ;;  %v2584_v18 = vmul.f32 %v3956_v16, %v2556_v42  ;;  %v2603_v29 = vadd.f32 %v3382_v7, %v2593_v19  ;;  %v3872_v42 = vld [vmem:[%s4197_s4 + $0x28] sm:$0xff]  }
 0xd62   : > { %2748 = vmatmul.mubr.bf16.vlgmr.msra.gmra.mrb[24].mxu1 %v2605_v17  ;;  %v2594_v20 = vmul.f32 %v3381_v57, %v2584_v18 }
 0xd63   : > { %2757 = vmatprep.mubr.bf16.mxu1 %v4023_v30  ;;  %v3865_v30 = vld [vmem:[%s4197_s4 + $0x50] sm:$0xff]  }
 0xd64   : > { %v2604_v21 = vadd.f32 %v3382_v7, %v2594_v20  ;;  %3548 = vmatprep.subr.bf16.mxu0 %v3865_v30 }
 0xd65   : > { %3549 = vmatpush3.bf16.msra.mxu0 %v3866_v38 }
 0xd66   : > { %v2606_v32 = vpack.c.bf16 %v2604_v21, %v2603_v29  ;;  %3550 = vmatprep.subr.bf16.mxu0 %v3867_v40 }
 0xd69   : > { %3551 = vmatpush3.bf16.msra.mxu0 %v3868_v41 }
 0xd6a   : > { %2758 = vmatmul.mubr.bf16.gmra.mrb[28].mxu1 %v2606_v32  ;;  %3552 = vmatprep.subr.bf16.mxu0 %v3869_v22 }
 0xd6d   : > { %3553 = vmatpush3.bf16.msra.mxu0 %v3870_v24 }
 0xd6e   : > { %3554 = vmatprep.subr.bf16.mxu0 %v3871_v26 }
 0xd71   : > { %3555 = vmatpush3.bf16.msra.mxu0 %v3872_v42 }
 0xd72   : > { %3556 = vmatprep.subr.bf16.mxu0 %v3873_v43 }
 0xd75   : > { %3557 = vmatpush3.bf16.msra.mxu0 %v3874_v44 }
 0xd76   : > { %3558 = vmatprep.subr.bf16.mxu0 %v3875_v23 }
 0xd79   : > { %3559 = vmatpush3.bf16.msra.mxu0 %v3876_v28 }
 0xe35   : > { %v2749_v27 = vpop.f32.mrb[24].mxu1 }
 0xe36   : > { %v4769_v48 = vadd.f32 %v2749_v27, %v2628_v45  ;;  %v2751_v46 = vpop.f32.mrb[25].mxu1 }
 0xe37   : > { %v4771_v47 = vadd.f32 %v2751_v46, %v2632_v25  ;;  %v2753_v49 = vpop.f32.mrb[26].mxu1 }
 0xe38   : > { %v2776_v51 = vmul.f32 0.044715, %v4769_v48  ;;  %v4774_v36 = vadd.f32 %v2753_v49, %v2628_v45  ;;  %v2755_v0 = vpop.f32.mrb[27].mxu1  ;;  %v2768_v49 = vmul.f32 0.5, %v4769_v48 }
 0xe39   : > { %v2777_v39 = vmul.f32 0.044715, %v4771_v47  ;;  %v4777_v62 = vadd.f32 %v2755_v0, %v2632_v25 }
 0xe3a   : > { %v2784_v6 = vmul.f32 %v2776_v51, %v4769_v48  ;;  %v2778_v5 = vmul.f32 0.044715, %v4774_v36  ;;  %v2770_v51 = vmul.f32 0.5, %v4774_v36 }
 0xe3b   : > { %v2785_v8 = vmul.f32 %v2777_v39, %v4771_v47  ;;  %v2779_v53 = vmul.f32 0.044715, %v4777_v62  ;;  %v2769_v39 = vmul.f32 0.5, %v4771_v47 }
 0xe3c   : > { %v2792_v55 = vmul.f32 %v2784_v6, %v4769_v48  ;;  %v2786_v1 = vmul.f32 %v2778_v5, %v4774_v36  ;;  %v2771_v6 = vmul.f32 0.5, %v4777_v62 }
 0xe3d   : > { %v2793_v56 = vmul.f32 %v2785_v8, %v4771_v47  ;;  %v2787_v63 = vmul.f32 %v2779_v53, %v4777_v62  ;;  %v2759_v50 = vpop.f32.mrb[28].mxu1 }
 0xe3e   : > { %v2800_v58 = vadd.f32 %v2792_v55, %v4769_v48  ;;  %v2794_v52 = vmul.f32 %v2786_v1, %v4774_v36  ;;  %v4789_v59 = vadd.f32 %v2759_v50, %v2628_v45  ;;  %v2761_v57 = vpop.f32.mrb[29].mxu1 }
 0xe3f   : > { %v2795_v61 = vmul.f32 %v2787_v63, %v4777_v62  ;;  %v4792_v60 = vadd.f32 %v2761_v57, %v2632_v25  ;;  %v2763_v54 = vpop.f32.mrb[30].mxu1  ;;  %v2801_v2 = vadd.f32 %v2793_v56, %v4771_v47 }
 0xe40   : > { %v2808_v3 = vmul.f32 0.7978846, %v2800_v58  ;;  %v2802_v7 = vadd.f32 %v2794_v52, %v4774_v36  ;;  %v2780_v9 = vmul.f32 0.044715, %v4789_v59  ;;  %v2764_v11 = vadd.f32 %v2763_v54, %v2628_v45  ;;  %v2765_v13 = vpop.f32.mrb[31].mxu1 }
 0xe41   : > { %v2781_v14 = vmul.f32 0.044715, %v4792_v60  ;;  %v2766_v16 = vadd.f32 %v2765_v13, %v2632_v25  ;;  %v2803_v17 = vadd.f32 %v2795_v61, %v4777_v62  ;;  %v2809_v18 = vmul.f32 0.7978846, %v2801_v2 }
 0xe42   : > { %3957 = vtanh.f32 %v2808_v3  ;;  %v2810_v19 = vmul.f32 0.7978846, %v2802_v7  ;;  %v2788_v20 = vmul.f32 %v2780_v9, %v4789_v59  ;;  %v2782_v21 = vmul.f32 0.044715, %v2764_v11 }
 0xe43   : > { %v2789_v29 = vmul.f32 %v2781_v14, %v4792_v60  ;;  %v2783_v32 = vmul.f32 0.044715, %v2766_v16  ;;  %v2811_v33 = vmul.f32 0.7978846, %v2803_v17  ;;  %3959 = vtanh.f32 %v2809_v18 }
 0xe44   : > { %3961 = vtanh.f32 %v2810_v19  ;;  %v2796_v34 = vmul.f32 %v2788_v20, %v4789_v59  ;;  %v2790_v35 = vmul.f32 %v2782_v21, %v2764_v11  ;;  %v2772_v47 = vmul.f32 0.5, %v4789_v59 }
 0xe45   : > { %v2797_v37 = vmul.f32 %v2789_v29, %v4792_v60  ;;  %v2791_v30 = vmul.f32 %v2783_v32, %v2766_v16  ;;  %3963 = vtanh.f32 %v2811_v33  ;;  %v2774_v36 = vmul.f32 0.5, %v2764_v11 }
 0xe46   : > { %v2798_v38 = vmul.f32 %v2790_v35, %v2764_v11  ;;  %v2804_v40 = vadd.f32 %v2796_v34, %v4789_v59  ;;  %v2773_v54 = vmul.f32 0.5, %v4792_v60  ;;  %v2775_v2 = vmul.f32 0.5, %v2766_v16  ;;  %v3399_v59 = vld [vmem:[%s766_s28] ss:$0 sm:$0xff] }
 0xe47   : > { %v2799_v41 = vmul.f32 %v2791_v30, %v2766_v16  ;;  %v2805_v22 = vadd.f32 %v2797_v37, %v4792_v60 }
 0xe48   : > { %v2806_v24 = vadd.f32 %v2798_v38, %v2764_v11  ;;  %v2812_v26 = vmul.f32 0.7978846, %v2804_v40 }
 0xe49   : > { %v2807_v42 = vadd.f32 %v2799_v41, %v2766_v16  ;;  %v2813_v43 = vmul.f32 0.7978846, %v2805_v22 }
 0xe4a   : > { %v2814_v44 = vmul.f32 0.7978846, %v2806_v24  ;;  %3965 = vtanh.f32 %v2812_v26 }
 0xe4b   : > { %v2815_v23 = vmul.f32 0.7978846, %v2807_v42  ;;  %3967 = vtanh.f32 %v2813_v43 }
 0xe4c   : > { %v3958_v28 = vpop.eup %3957  ;;  %3969 = vtanh.f32 %v2814_v44 }
 0xe4d   : > { %v3960_v31 = vpop.eup %3959  ;;  %v2824_v45 = vadd.f32 1.0, %v3958_v28  ;;  %3971 = vtanh.f32 %v2815_v23 }
 0xe4e   : > { %v3962_v25 = vpop.eup %3961  ;;  %v2825_v27 = vadd.f32 1.0, %v3960_v31 }
 0xe4f   : > { %v3964_v46 = vpop.eup %3963  ;;  %v2826_v0 = vadd.f32 1.0, %v3962_v25  ;;  %v2832_v8 = vmul.f32 %v2824_v45, %v2768_v49 }
 0xe50   : > { %v2827_v5 = vadd.f32 1.0, %v3964_v46  ;;  %v2833_v55 = vmul.f32 %v2825_v27, %v2769_v39 }
 0xe51   : > { %v2834_v53 = vmul.f32 %v2826_v0, %v2770_v51 }
 0xe52   : > { %v2835_v1 = vmul.f32 %v2827_v5, %v2771_v6 }
 0xe53   : > { %v2840_v56 = vpack.c.bf16 %v2834_v53, %v2832_v8 }
 0xe54   : > { %v3966_v63 = vpop.eup %3965  ;;  %v2841_v50 = vpack.c.bf16 %v2835_v1, %v2833_v55 }
 0xe55   : > { %v3968_v58 = vpop.eup %3967  ;;  %v2828_v52 = vadd.f32 1.0, %v3966_v63 }
 0xe56   : > { %v3970_v57 = vpop.eup %3969  ;;  %3011 = vmatprep.mubr.bf16.mxu0 %v2841_v50  ;;  %v2829_v48 = vadd.f32 1.0, %v3968_v58 }
 0xe57   : > { %v3972_v61 = vpop.eup %3971  ;;  %3012 = vmatmul.mubr.bf16.vlgmr.msra.gmra.mrb[24].mxu0 %v2840_v56  ;;  %v2830_v62 = vadd.f32 1.0, %v3970_v57  ;;  %v2836_v7 = vmul.f32 %v2828_v52, %v2772_v47 }
 0xe58   : > { %v2831_v3 = vadd.f32 1.0, %v3972_v61  ;;  %v2837_v13 = vmul.f32 %v2829_v48, %v2773_v54 }
 0xe59   : > { %v2838_v9 = vmul.f32 %v2830_v62, %v2774_v36  ;;  %v3417_v62 = vld [vmem:[%s4902_s27] ss:$0 sm:$0xff] (!%p3416_p5) }
 0xe5a   : > { %v2839_v14 = vmul.f32 %v2831_v3, %v2775_v2  ;;  %v3418_v2 = vld [vmem:[%s4903_s29] ss:$0 sm:$0xff] (!%p3416_p5) }
 0xe5b   : > { %v2842_v17 = vpack.c.bf16 %v2838_v9, %v2836_v7 }
 0xe5c   : > { %v2843_v18 = vpack.c.bf16 %v2839_v14, %v2837_v13 }
 0xe5e   : > { %3019 = vmatprep.mubr.bf16.mxu0 %v2843_v18 }
 0xe5f   : > { %3020 = vmatmul.mubr.bf16.gmra.mrb[28].mxu0 %v2842_v17 }
 0xf2a   : > { %v3560_v19 = vpop.f32.mrb[24].mxu0 }
 0xf2b   : > { %v3561_v11 = vpop.f32.mrb[25].mxu0 }
 0xf2c   : > { %v3562_v20 = vadd.f32 %v3561_v11, %v3560_v19  ;;  %v3563_v21 = vpop.f32.mrb[26].mxu0 }
 0xf2d   : > { %v3564_v60 = vpop.f32.mrb[27].mxu0 }
 0xf2e   : > { %v3014_v16 = vadd.f32 %v3562_v20, %v3399_v59  ;;  %v3565_v29 = vadd.f32 %v3564_v60, %v3563_v21 }
 0xf30   : > { %v3028_v32 = vadd.f32 %v3014_v16, %v4705_v4  ;;  %v3017_v33 = vadd.f32 %v3565_v29, %v3399_v59 }
 0xf32   : > { %3032 = vst [vmem:[#allocation2] sm:$0xff] %v3028_v32  ;;  %v3029_v34 = vadd.f32 %v3017_v33, %v4707_v10  ;;  %v3566_v35 = vpop.f32.mrb[28].mxu0 }
 0xf33   : > { %v3567_v37 = vpop.f32.mrb[29].mxu0 }
 0xf34   : > { %3033 = vst [vmem:[#allocation2 + $0x8] sm:$0xff] %v3029_v34  ;;  %v3568_v30 = vadd.f32 %v3567_v37, %v3566_v35  ;;  %v3569_v38 = vpop.f32.mrb[30].mxu0 }
 0xf35   : > { %v3570_v40 = vpop.f32.mrb[31].mxu0 }
 0xf36   : > { %v3022_v41 = vadd.f32 %v3568_v30, %v3399_v59  ;;  %v3571_v22 = vadd.f32 %v3570_v40, %v3569_v38  ;;  %3039 = sbr.rel (%p3416_p5) target bundleno = 4222 (0x107e), region = 104 }
 0xf38   : > { %v3030_v24 = vadd.f32 %v3022_v41, %v4710_v12  ;;  %v3025_v26 = vadd.f32 %v3571_v22, %v3399_v59 }
 0xf39   : > { %v3040_v4 = vld [vmem:[#allocation2] sm:$0xff] (!%p3416_p5) }
 0xf3a   : > { %3034 = vst [vmem:[#allocation2 + $0x10] sm:$0xff] %v3030_v24  ;;  %v3031_v42 = vadd.f32 %v3025_v26, %v4714_v15  ;;  %3046 = vadd.xlane.f32.xlu0 (!%p3416_p5), %v3040_v4 }
 0xf3b   : > { %v3041_v43 = vld [vmem:[#allocation2 + $0x8] sm:$0xff] (!%p3416_p5) }
 0xf3c   : > { %3035 = vst [vmem:[#allocation2 + $0x18] sm:$0xff] %v3031_v42 }
 0xf3e   : > { %3048 = vadd.xlane.f32.xlu0 %v3041_v43 }
 0xf41   : > { %v3042_v10 = vld [vmem:[#allocation2 + $0x10] sm:$0xff] }
 0xf42   : > { %3050 = vadd.xlane.f32.xlu1 %v3042_v10 }
 0xf43   : > { %v3043_v44 = vld [vmem:[#allocation2 + $0x18] sm:$0xff] }
 0xf46   : > { %3052 = vadd.xlane.f32.xlu1 %v3043_v44 }
 0xfc7   : > { %v3047_v23 = vpop.xlane.xlu0 %3046 }
 0xfc8   : > { %v3054_v31 = vmul.f32 0.0078125, %v3047_v23 }
 0xfca   : > { %v3058_v45 = vsub.f32 %v3040_v4, %v3054_v31 }
 0xfcb   : > { %v3049_v27 = vpop.xlane.xlu0 %3048 }
 0xfcc   : > { %v3055_v46 = vmul.f32 0.0078125, %v3049_v27  ;;  %v3062_v49 = vmul.f32 %v3058_v45, %v3058_v45 }
 0xfce   : > { %v3059_v0 = vsub.f32 %v3041_v43, %v3055_v46  ;;  %3066 = vadd.xlane.f32.xlu0 %v3062_v49 }
 0xfcf   : > { %v3051_v28 = vpop.xlane.xlu1 %3050 }
 0xfd0   : > { %v3056_v12 = vmul.f32 0.0078125, %v3051_v28  ;;  %v3063_v5 = vmul.f32 %v3059_v0, %v3059_v0 }
 0xfd2   : > { %v3060_v25 = vsub.f32 %v3042_v10, %v3056_v12  ;;  %3068 = vadd.xlane.f32.xlu1 %v3063_v5 }
 0xfd3   : > { %v3053_v15 = vpop.xlane.xlu1 %3052 }
 0xfd4   : > { %v3057_v51 = vmul.f32 0.0078125, %v3053_v15  ;;  %v3064_v6 = vmul.f32 %v3060_v25, %v3060_v25 }
 0xfd6   : > { %v3061_v39 = vsub.f32 %v3043_v44, %v3057_v51  ;;  %3070 = vadd.xlane.f32.xlu0 %v3064_v6 }
 0xfd8   : > { %v3065_v8 = vmul.f32 %v3061_v39, %v3061_v39 }
 0xfda   : > { %3072 = vadd.xlane.f32.xlu1 %v3065_v8 }
0x105b   : > { %v3067_v53 = vpop.xlane.xlu0 %3066 }
0x105c   : > { %v3074_v55 = vmul.f32 0.0078125, %v3067_v53 }
0x105e   : > { %v3078_v1 = vadd.f32 1e-05, %v3074_v55 }
0x105f   : > { %v3069_v56 = vpop.xlane.xlu1 %3068 }
0x1060   : > { %3977 = vrsqrt.f32 %v3078_v1  ;;  %v3075_v50 = vmul.f32 0.0078125, %v3069_v56 }
0x1062   : > { %v3079_v52 = vadd.f32 1e-05, %v3075_v50 }
0x1063   : > { %v3071_v63 = vpop.xlane.xlu0 %3070 }
0x1064   : > { %v3076_v58 = vmul.f32 0.0078125, %v3071_v63  ;;  %3979 = vrsqrt.f32 %v3079_v52 }
0x1066   : > { %v3080_v57 = vadd.f32 1e-05, %v3076_v58 }
0x1067   : > { %v3073_v48 = vpop.xlane.xlu1 %3072 }
0x1068   : > { %v3077_v61 = vmul.f32 0.0078125, %v3073_v48  ;;  %3981 = vrsqrt.f32 %v3080_v57 }
0x106a   : > { %v3081_v47 = vadd.f32 1e-05, %v3077_v61  ;;  %v3978_v36 = vpop.eup %3977 }
0x106b   : > { %v3086_v54 = vmul.f32 %v3978_v36, %v3058_v45 }
0x106c   : > { %3983 = vrsqrt.f32 %v3081_v47 }
0x106d   : > { %v3096_v3 = vmul.f32 %v3417_v62, %v3086_v54 }
0x106e   : > { %v3980_v7 = vpop.eup %3979 }
0x106f   : > { %v3106_v13 = vadd.f32 %v3418_v2, %v3096_v3  ;;  %v3087_v14 = vmul.f32 %v3980_v7, %v3059_v0 }
0x1071   : > { %3110 = vst [vmem:[#allocation2] sm:$0xff] %v3106_v13  ;;  %v3097_v18 = vmul.f32 %v3417_v62, %v3087_v14 }
0x1072   : > { %v3982_v9 = vpop.eup %3981 }
0x1073   : > { %v3088_v17 = vmul.f32 %v3982_v9, %v3060_v25  ;;  %v3107_v11 = vadd.f32 %v3418_v2, %v3097_v18 }
0x1075   : > { %v3098_v59 = vmul.f32 %v3417_v62, %v3088_v17  ;;  %3111 = vst [vmem:[#allocation2 + $0x8] sm:$0xff] %v3107_v11 }
0x1076   : > { %v3984_v19 = vpop.eup %3983 }
0x1077   : > { %v3089_v20 = vmul.f32 %v3984_v19, %v3061_v39  ;;  %v3108_v21 = vadd.f32 %v3418_v2, %v3098_v59 }
0x1079   : > { %v3099_v60 = vmul.f32 %v3417_v62, %v3089_v20  ;;  %3112 = vst [vmem:[#allocation2 + $0x10] sm:$0xff] %v3108_v21 }
0x107b   : > { %v3109_v16 = vadd.f32 %v3418_v2, %v3099_v60 }
0x107d   : > { %3113 = vst [vmem:[#allocation2 + $0x18] sm:$0xff] %v3109_v16 }
0x107e PF: > { %p3710_p6 = scmp.eq.s32.totalorder %s4136_s30, 2  ;;  %s4027_s6 = smov [#allocation2]  }
0x107f   : > { %s3120_s22 = sshll.u32 %s4027_s6, 4  ;;  %s3121_s22 = int_to_ptr.vmem [resolvable:$true] %s3120_s22 }
0x1080   : > { %s3985_s9 = scalar_lea.vmem %s3121_s22, 512  ;;  %p3992_p10 = scmp.lt.s32.totalorder %s3121_s22, %s3121_s22 }
0x1081   : > { %p3986_p7 = scmp.ne.s32.totalorder %s3121_s22, %s3985_s9  ;;  %p3993_p11 = scmp.lt.s32.totalorder %s3985_s9, %s3985_s9 }
0x1083   : > { %p3987_p8 = pnand %p3986_p7, %p3710_p6  ;;  %p3994_p12 = por %p3993_p11, %p3992_p10 }
0x1085   : > { %p3988_p9 = pneg %p3987_p8 }
0x1087   : > { %p3995_p13 = pnand %p3994_p12, %p3988_p9 }
0x1089   : > { %3998 = shalt.err (!%p3995_p13)
}
0x108a   : > { %s4904_s2 = sld [smem:[#allocation15_spill]] }
0x1090   : > { %s3999_s23 = scalar_lea.hbm %s4904_s2, 512 }
0x1091   : > { %p4000_p0 = scmp.ne.s32.totalorder %s4904_s2, %s3999_s23  ;;  %p4005_p3 = scmp.lt.u32.totalorder %s3999_s23, %s4904_s2 }
0x1093   : > { %p4001_p1 = pnand %p4000_p0, %p3710_p6 }
0x1095   : > { %p4002_p2 = pneg %p4001_p1 }
0x1097   : > { %p4007_p4 = pnand %p4005_p3, %p4002_p2 }
0x1099   : > { %4010 = shalt.err (!%p4007_p4)
}
0x109a   : > { %s4028_s28 = smov 128   ;;  %s4029_s27 = smov 8  }
0x109b   : > { %3707 = dma.vmem_to_hbm [thread:$0]  (%p3710_p6), %s3121_s22, 512, %s4904_s2, [#allocation3], %s4028_s28, %s4028_s28, %s4029_s27  }
0x109c   : > { %4016 = dma.done.wait (%p3710_p6), [#allocation3], 512  }
0x109d   : > { %4018 = vsyncadd (%p3710_p6), [#allocation3], 4294966784 }
0x109e PF: > { %s4905_s29 = sld [smem:[#allocation5_spill]] }
0x10a4   : > { %s30_s0 = sadd.s32 1, %s4905_s29  }
0x10a5   : > { %p27_p5 = scmp.ge.s32.totalorder %s30_s0, 5  }
0x10a7   :  { %29 = sbr.rel (!%p27_p5) target bundleno = 12 (0xc), region = 164 }
0x10ae   :  { %3136 = vsyncpa [#allocation3], 1 }
0x10af   :  { %3138 = vsyncpa [#allocation3 + $0x1], 1 }

</bundles_post_ra>
